<compile_context>
chip_gen: v6e
topology: v6e:2x2x1
jax: 0.10.0
libtpu: 0.0.40
codegen_flags: <defaults>
</compile_context>

<pallas_src>
import functools

import jax
import jax.numpy as jnp
from jax import lax
from jax.experimental import pallas as pl
from jax.experimental.pallas import tpu as pltpu


def _round_up(a, b):
    return (a + b - 1) // b * b


def _pick_tile(n, candidates):
    for t in candidates:
        if n % t == 0:
            return t
    return n


def pam_kernel(x_q_ref, x_k_ref, wq_ref, bq_ref, wk_ref, bk_ref, wv_ref,
               bv_ref, gamma_ref, o_ref, q_sc, m_sc, l_sc, acc_sc, *,
               n_valid, tile_k, need_mask, compute_dtype):
    ki = pl.program_id(2)
    nk = pl.num_programs(2)

    # --- per q-tile init: project Q once, reset the online-softmax state. ---
    @pl.when(ki == 0)
    def _init():
        xq = x_q_ref[0].astype(compute_dtype)                            # (Tq, C)
        q = jnp.dot(xq, wq_ref[...],
                    preferred_element_type=jnp.float32) + bq_ref[...]    # (Tq, Cq)
        q_sc[...] = q.astype(compute_dtype)
        m_sc[...] = jnp.full(m_sc.shape, -jnp.inf, m_sc.dtype)
        l_sc[...] = jnp.zeros(l_sc.shape, l_sc.dtype)
        acc_sc[...] = jnp.zeros(acc_sc.shape, acc_sc.dtype)

    # --- key tile: sliver K projection + one (Tq, Tk) score tile. ---
    xk = x_k_ref[0]                                                      # (Tk, C) f32
    xk_c = xk.astype(compute_dtype)
    k = (jnp.dot(xk_c, wk_ref[...], preferred_element_type=jnp.float32)
         + bk_ref[...])                                                  # (Tk, Cq) f32
    k_c = k.astype(compute_dtype)

    # energy[i, j] = sum_c q[i, c] * k[j, c]  (channel contraction, no transpose).
    s = lax.dot_general(q_sc[...], k_c, (((1,), (1,)), ((), ())),
                        preferred_element_type=jnp.float32)              # (Tq, Tk)

    if need_mask:  # static: only emitted when the spatial dim was padded.
        key_pos = ki * tile_k + lax.broadcasted_iota(jnp.int32, s.shape, 1)
        s = jnp.where(key_pos < n_valid, s, -1e30)

    # --- online softmax update (f32 math). ---
    m_prev = m_sc[...]
    m_new = jnp.maximum(m_prev, jnp.max(s, axis=-1, keepdims=True))
    alpha = jnp.exp(m_prev - m_new)
    p = jnp.exp(s - m_new)                                               # (Tq, Tk)
    l_sc[...] = alpha * l_sc[...] + jnp.sum(p, axis=-1, keepdims=True)
    # Aggregate *raw* x with the unnormalized weights; Wv/bv are applied at finalize
    # (exact because softmax rows sum to 1 after normalization).
    acc_sc[...] = alpha * acc_sc[...] + lax.dot_general(
        p.astype(compute_dtype), xk_c, (((1,), (0,)), ((), ())),
        preferred_element_type=jnp.float32)                              # (Tq, C)
    m_sc[...] = m_new

    # --- finalize: deferred normalization, value projection, residual. ---
    @pl.when(ki == nk - 1)
    def _finalize():
        inv_l = pl.reciprocal(l_sc[...], approx=True)                    # (Tq, 1)
        ctx = acc_sc[...] * inv_l                                        # (Tq, C)
        out = (jnp.dot(ctx.astype(compute_dtype), wv_ref[...],
                       preferred_element_type=jnp.float32) + bv_ref[...])
        o_ref[0] = (gamma_ref[0] * out + x_q_ref[0]).astype(o_ref.dtype)


def pam_forward(x, wq, bq, wk, bk, wv, bv, gamma, *,
                tile_q=None, tile_k=None, compute_dtype=jnp.float32):
    """PAM forward.  x: (B, C, H, W) f32.  wq/wk: (C//8, C), wv: (C, C)."""
    B, C, H, W = x.shape
    N = H * W
    Cq = wq.shape[0]

    # (B, C, H, W) -> (B, N, C): spatial on sublanes / grid axis, channels on lanes.
    x_nc = jnp.transpose(x.reshape(B, C, N).astype(jnp.float32), (0, 2, 1))

    # Pad the spatial dim to a multiple of 128 so score tiles are lane-dense.
    # Padded keys are masked in-kernel; padded query rows are sliced off below.
    n_pad = _round_up(N, 128)
    if tile_q is None:
        tile_q = _pick_tile(n_pad, (256, 128))   # sized against v7x's 64 MiB VMEM;
    if tile_k is None:                           # sweep larger tiles on v5e/v6e.
        tile_k = _pick_tile(n_pad, (512, 256, 128))
    assert n_pad % tile_q == 0 and n_pad % tile_k == 0
    if n_pad != N:
        x_nc = jnp.pad(x_nc, ((0, 0), (0, n_pad - N), (0, 0)))

    wq_t = wq.T.astype(compute_dtype)                  # (C, Cq)
    wk_t = wk.T.astype(compute_dtype)                  # (C, Cq)
    wv_t = wv.T.astype(compute_dtype)                  # (C, C)
    bq2 = bq.reshape(1, Cq).astype(jnp.float32)
    bk2 = bk.reshape(1, Cq).astype(jnp.float32)
    bv2 = bv.reshape(1, C).astype(jnp.float32)
    gamma1 = jnp.reshape(gamma, (1,)).astype(jnp.float32)

    grid = (B, n_pad // tile_q, n_pad // tile_k)
    kernel = functools.partial(pam_kernel, n_valid=N, tile_k=tile_k,
                               need_mask=(n_pad != N),
                               compute_dtype=compute_dtype)

    # Per-step VMEM (double-buffered x tiles + weights + (Tq,Tk) scores + scratch)
    # stays well under the default scoped VMEM limit on v5e/v6e/v7x for these tiles;
    # raise vmem_limit_bytes in CompilerParams if sweeping bigger tiles on v5e/v6e.
    out_nc = pl.pallas_call(
        kernel,
        out_shape=jax.ShapeDtypeStruct((B, n_pad, C), jnp.float32),
        grid=grid,
        in_specs=[
            pl.BlockSpec((1, tile_q, C), lambda b, qi, ki: (b, qi, 0)),  # x, query tile
            pl.BlockSpec((1, tile_k, C), lambda b, qi, ki: (b, ki, 0)),  # x, key/value tile
            pl.BlockSpec((C, Cq), lambda b, qi, ki: (0, 0)),             # Wq^T
            pl.BlockSpec((1, Cq), lambda b, qi, ki: (0, 0)),             # bq
            pl.BlockSpec((C, Cq), lambda b, qi, ki: (0, 0)),             # Wk^T
            pl.BlockSpec((1, Cq), lambda b, qi, ki: (0, 0)),             # bk
            pl.BlockSpec((C, C), lambda b, qi, ki: (0, 0)),              # Wv^T
            pl.BlockSpec((1, C), lambda b, qi, ki: (0, 0)),              # bv
            pl.BlockSpec(memory_space=pltpu.MemorySpace.SMEM),           # gamma scalar
        ],
        out_specs=pl.BlockSpec((1, tile_q, C), lambda b, qi, ki: (b, qi, 0)),
        scratch_shapes=[
            pltpu.VMEM((tile_q, Cq), compute_dtype),   # projected Q tile
            pltpu.VMEM((tile_q, 1), jnp.float32),      # running row max
            pltpu.VMEM((tile_q, 1), jnp.float32),      # running denominator
            pltpu.VMEM((tile_q, C), jnp.float32),      # attention-weighted x accumulator
        ],
        compiler_params=pltpu.CompilerParams(
            dimension_semantics=("parallel", "parallel", "arbitrary")),
    )(x_nc, x_nc, wq_t, bq2, wk_t, bk2, wv_t, bv2, gamma1)

    out_nc = out_nc[:, :N, :]
    return jnp.transpose(out_nc, (0, 2, 1)).reshape(B, C, H, W)


def pam_reference(x, wq, bq, wk, bk, wv, bv, gamma):
    """Plain-JAX reference mirroring the PyTorch forward."""
    B, C, H, W = x.shape
    N = H * W
    xf = x.reshape(B, C, N)
    q = jnp.einsum('oc,bcn->bon', wq, xf) + bq[None, :, None]   # (B, Cq, N)
    k = jnp.einsum('oc,bcn->bon', wk, xf) + bk[None, :, None]   # (B, Cq, N)
    v = jnp.einsum('oc,bcn->bon', wv, xf) + bv[None, :, None]   # (B, C, N)
    energy = jnp.einsum('bci,bcj->bij', q, k)                   # (B, N, N)
    attn = jax.nn.softmax(energy, axis=-1)
    out = jnp.einsum('bcn,bin->bci', v, attn)                   # (B, C, N)
    out = out.reshape(B, C, H, W)
    return gamma * out + x


if __name__ == "__main__":
    B, C, H, W = 2, 16, 8, 8
    Cq = C // 8

    key = jax.random.PRNGKey(0)
    kx, kq, kbq, kk, kbk, kv, kbv = jax.random.split(key, 7)

    x = jax.random.normal(kx, (B, C, H, W), dtype=jnp.float32)
    wq = 0.1 * jax.random.normal(kq, (Cq, C), dtype=jnp.float32)
    bq = 0.1 * jax.random.normal(kbq, (Cq,), dtype=jnp.float32)
    wk = 0.1 * jax.random.normal(kk, (Cq, C), dtype=jnp.float32)
    bk = 0.1 * jax.random.normal(kbk, (Cq,), dtype=jnp.float32)
    wv = 0.1 * jax.random.normal(kv, (C, C), dtype=jnp.float32)
    bv = 0.1 * jax.random.normal(kbv, (C,), dtype=jnp.float32)

    # gamma is initialized to zero in the PyTorch module -> output must equal x.
    gamma0 = jnp.zeros((1,), dtype=jnp.float32)
    out0 = jax.block_until_ready(pam_forward(x, wq, bq, wk, bk, wv, bv, gamma0))
    ref0 = pam_reference(x, wq, bq, wk, bk, wv, bv, gamma0)
    assert jnp.allclose(out0, ref0, atol=1e-5, rtol=1e-5), "gamma=0 mismatch"

    # gamma != 0 so the attention path (online softmax, masking, padding) is exercised.
    gamma1 = jnp.ones((1,), dtype=jnp.float32)
    out1 = jax.block_until_ready(pam_forward(x, wq, bq, wk, bk, wv, bv, gamma1))
    ref1 = pam_reference(x, wq, bq, wk, bk, wv, bv, gamma1)
    assert jnp.allclose(out1, ref1, atol=5e-3, rtol=5e-3), "gamma=1 mismatch"

    # bf16 MXU path (v6e/v7x-friendly), looser tolerance.
    out_bf = jax.block_until_ready(
        pam_forward(x, wq, bq, wk, bk, wv, bv, gamma1, compute_dtype=jnp.bfloat16))
    assert jnp.allclose(out_bf, ref1, atol=5e-2, rtol=5e-2), "bf16 mismatch"

    print("KERNEL_OK")
</pallas_src>

<mosaic_0001>
module attributes {stable_mosaic.version = 11 : i64} {
  func.func @pam_kernel(%arg0: i32, %arg1: i32, %arg2: i32, %arg3: memref<1x128x16xf32, #tpu.memory_space<vmem>>, %arg4: memref<1x128x16xf32, #tpu.memory_space<vmem>>, %arg5: memref<16x2xf32, #tpu.memory_space<vmem>>, %arg6: memref<1x2xf32, #tpu.memory_space<vmem>>, %arg7: memref<16x2xf32, #tpu.memory_space<vmem>>, %arg8: memref<1x2xf32, #tpu.memory_space<vmem>>, %arg9: memref<16x16xf32, #tpu.memory_space<vmem>>, %arg10: memref<1x16xf32, #tpu.memory_space<vmem>>, %arg11: memref<1xf32, #tpu.memory_space<smem>>, %arg12: memref<1x128x16xf32, #tpu.memory_space<vmem>>, %arg13: memref<128x2xf32, #tpu.memory_space<vmem>>, %arg14: memref<128x1xf32, #tpu.memory_space<vmem>>, %arg15: memref<128x1xf32, #tpu.memory_space<vmem>>, %arg16: memref<128x16xf32, #tpu.memory_space<vmem>>) attributes {dimension_semantics = [#tpu.dimension_semantics<parallel>, #tpu.dimension_semantics<parallel>, #tpu.dimension_semantics<arbitrary>], iteration_bounds = array<i64: 2, 1, 1>, scalar_prefetch = 0 : i64, scratch_operands = 4 : i64, tpu.core_type = #tpu.core_type<tc>, window_params = [{transform_indices = @transform_0, window_bounds = array<i64: 1, 128, 16>}, {transform_indices = @transform_1, window_bounds = array<i64: 1, 128, 16>}, {pipeline_mode = #tpu.pipeline_mode<synchronous>, transform_indices = @transform_2, window_bounds = array<i64: 16, 2>}, {pipeline_mode = #tpu.pipeline_mode<synchronous>, transform_indices = @transform_3, window_bounds = array<i64: 1, 2>}, {pipeline_mode = #tpu.pipeline_mode<synchronous>, transform_indices = @transform_4, window_bounds = array<i64: 16, 2>}, {pipeline_mode = #tpu.pipeline_mode<synchronous>, transform_indices = @transform_5, window_bounds = array<i64: 1, 2>}, {pipeline_mode = #tpu.pipeline_mode<synchronous>, transform_indices = @transform_6, window_bounds = array<i64: 16, 16>}, {pipeline_mode = #tpu.pipeline_mode<synchronous>, transform_indices = @transform_7, window_bounds = array<i64: 1, 16>}, {transform_indices = @transform_8, window_bounds = array<i64: 1>}, {transform_indices = @transform_9, window_bounds = array<i64: 1, 128, 16>}]} {
    %c0_i32 = arith.constant 0 : i32
    %0 = arith.cmpi eq, %arg2, %c0_i32 : i32
    %1 = arith.extui %0 : i1 to i32
    %c0_i32_0 = arith.constant 0 : i32
    %2 = arith.cmpi ne, %1, %c0_i32_0 : i32
    scf.if %2 {
      %c0_28 = arith.constant 0 : index
      %c0_29 = arith.constant 0 : index
      %c0_30 = arith.constant 0 : index
      %45 = vector.load %arg3[%c0_28, %c0_29, %c0_30] : memref<1x128x16xf32, #tpu.memory_space<vmem>>, vector<1x128x16xf32>
      %46 = vector.shape_cast %45 : vector<1x128x16xf32> to vector<128x16xf32>
      %c0_31 = arith.constant 0 : index
      %c0_32 = arith.constant 0 : index
      %47 = vector.load %arg5[%c0_31, %c0_32] : memref<16x2xf32, #tpu.memory_space<vmem>>, vector<16x2xf32>
      %cst_33 = arith.constant dense<0.000000e+00> : vector<128x2xf32>
      %48 = tpu.matmul %46, %47, %cst_33 {dimension_numbers = #tpu.dot_dimension_numbers<[1], [0], [0], [1], [0, 0, 1, 1], [], []>} : vector<128x16xf32>, vector<16x2xf32>, vector<128x2xf32> -> vector<128x2xf32>
      %c0_34 = arith.constant 0 : index
      %c0_35 = arith.constant 0 : index
      %49 = vector.load %arg6[%c0_34, %c0_35] : memref<1x2xf32, #tpu.memory_space<vmem>>, vector<1x2xf32>
      %50 = vector.broadcast %49 : vector<1x2xf32> to vector<128x2xf32>
      %51 = arith.addf %48, %50 : vector<128x2xf32>
      %c0_36 = arith.constant 0 : index
      %c0_37 = arith.constant 0 : index
      %52 = vector.load %arg13[%c0_36, %c0_37] : memref<128x2xf32, #tpu.memory_space<vmem>>, vector<128x2xf32>
      tpu.vector_store %arg13[%c0_36, %c0_37], %51 {strides = array<i32>} : memref<128x2xf32, #tpu.memory_space<vmem>>, vector<128x2xf32>,
      %cst_38 = arith.constant 0xFF800000 : f32
      %53 = vector.broadcast %cst_38 : f32 to vector<128x1xf32>
      %c0_39 = arith.constant 0 : index
      %c0_40 = arith.constant 0 : index
      %54 = vector.load %arg14[%c0_39, %c0_40] : memref<128x1xf32, #tpu.memory_space<vmem>>, vector<128x1xf32>
      tpu.vector_store %arg14[%c0_39, %c0_40], %53 {strides = array<i32>} : memref<128x1xf32, #tpu.memory_space<vmem>>, vector<128x1xf32>,
      %cst_41 = arith.constant 0.000000e+00 : f32
      %55 = vector.broadcast %cst_41 : f32 to vector<128x1xf32>
      %c0_42 = arith.constant 0 : index
      %c0_43 = arith.constant 0 : index
      %56 = vector.load %arg15[%c0_42, %c0_43] : memref<128x1xf32, #tpu.memory_space<vmem>>, vector<128x1xf32>
      tpu.vector_store %arg15[%c0_42, %c0_43], %55 {strides = array<i32>} : memref<128x1xf32, #tpu.memory_space<vmem>>, vector<128x1xf32>,
      %cst_44 = arith.constant 0.000000e+00 : f32
      %57 = vector.broadcast %cst_44 : f32 to vector<128x16xf32>
      %c0_45 = arith.constant 0 : index
      %c0_46 = arith.constant 0 : index
      %58 = vector.load %arg16[%c0_45, %c0_46] : memref<128x16xf32, #tpu.memory_space<vmem>>, vector<128x16xf32>
      tpu.vector_store %arg16[%c0_45, %c0_46], %57 {strides = array<i32>} : memref<128x16xf32, #tpu.memory_space<vmem>>, vector<128x16xf32>,
    } else {
    }
    %c0 = arith.constant 0 : index
    %c0_1 = arith.constant 0 : index
    %c0_2 = arith.constant 0 : index
    %3 = vector.load %arg4[%c0, %c0_1, %c0_2] : memref<1x128x16xf32, #tpu.memory_space<vmem>>, vector<1x128x16xf32>
    %4 = vector.shape_cast %3 : vector<1x128x16xf32> to vector<128x16xf32>
    %c0_3 = arith.constant 0 : index
    %c0_4 = arith.constant 0 : index
    %5 = vector.load %arg7[%c0_3, %c0_4] : memref<16x2xf32, #tpu.memory_space<vmem>>, vector<16x2xf32>
    %cst = arith.constant dense<0.000000e+00> : vector<128x2xf32>
    %6 = tpu.matmul %4, %5, %cst {dimension_numbers = #tpu.dot_dimension_numbers<[1], [0], [0], [1], [0, 0, 1, 1], [], []>} : vector<128x16xf32>, vector<16x2xf32>, vector<128x2xf32> -> vector<128x2xf32>
    %c0_5 = arith.constant 0 : index
    %c0_6 = arith.constant 0 : index
    %7 = vector.load %arg8[%c0_5, %c0_6] : memref<1x2xf32, #tpu.memory_space<vmem>>, vector<1x2xf32>
    %8 = vector.broadcast %7 : vector<1x2xf32> to vector<128x2xf32>
    %9 = arith.addf %6, %8 : vector<128x2xf32>
    %c0_7 = arith.constant 0 : index
    %c0_8 = arith.constant 0 : index
    %10 = vector.load %arg13[%c0_7, %c0_8] : memref<128x2xf32, #tpu.memory_space<vmem>>, vector<128x2xf32>
    %cst_9 = arith.constant dense<0.000000e+00> : vector<128x128xf32>
    %11 = tpu.matmul %10, %9, %cst_9 {dimension_numbers = #tpu.dot_dimension_numbers<[1], [1], [0], [0], [0, 0, 1, 0], [], []>} : vector<128x2xf32>, vector<128x2xf32>, vector<128x128xf32> -> vector<128x128xf32>
    %c128_i32 = arith.constant 128 : i32
    %12 = arith.muli %arg2, %c128_i32 : i32
    %13 = tpu.iota {dimensions = array<i32: 1>} : vector<128x128xi32>
    %14 = vector.broadcast %12 : i32 to vector<128x128xi32>
    %15 = arith.addi %14, %13 : vector<128x128xi32>
    %c64_i32 = arith.constant 64 : i32
    %16 = vector.broadcast %c64_i32 : i32 to vector<128x128xi32>
    %17 = arith.cmpi slt, %15, %16 : vector<128x128xi32>
    %cst_10 = arith.constant -1.000000e+30 : f32
    %18 = vector.broadcast %cst_10 : f32 to vector<128x128xf32>
    %19 = arith.select %17, %11, %18 : vector<128x128xi1>, vector<128x128xf32>
    %c0_11 = arith.constant 0 : index
    %c0_12 = arith.constant 0 : index
    %20 = vector.load %arg14[%c0_11, %c0_12] : memref<128x1xf32, #tpu.memory_space<vmem>>, vector<128x1xf32>
    %cst_13 = arith.constant dense<0xFF800000> : vector<128xf32>
    %21 = vector.multi_reduction <maximumf>, %19, %cst_13 [1] : vector<128x128xf32> to vector<128xf32>
    %22 = vector.shape_cast %21 : vector<128xf32> to vector<128x1xf32>
    %23 = arith.maximumf %20, %22 : vector<128x1xf32>
    %24 = arith.subf %20, %23 : vector<128x1xf32>
    %25 = math.exp %24 : vector<128x1xf32>
    %26 = vector.broadcast %23 : vector<128x1xf32> to vector<128x128xf32>
    %27 = arith.subf %19, %26 : vector<128x128xf32>
    %28 = math.exp %27 : vector<128x128xf32>
    %c0_14 = arith.constant 0 : index
    %c0_15 = arith.constant 0 : index
    %29 = vector.load %arg15[%c0_14, %c0_15] : memref<128x1xf32, #tpu.memory_space<vmem>>, vector<128x1xf32>
    %30 = arith.mulf %25, %29 : vector<128x1xf32>
    %cst_16 = arith.constant dense<0.000000e+00> : vector<128xf32>
    %31 = vector.multi_reduction <add>, %28, %cst_16 [1] : vector<128x128xf32> to vector<128xf32>
    %32 = vector.shape_cast %31 : vector<128xf32> to vector<128x1xf32>
    %33 = arith.addf %30, %32 : vector<128x1xf32>
    %c0_17 = arith.constant 0 : index
    %c0_18 = arith.constant 0 : index
    %34 = vector.load %arg15[%c0_17, %c0_18] : memref<128x1xf32, #tpu.memory_space<vmem>>, vector<128x1xf32>
    tpu.vector_store %arg15[%c0_17, %c0_18], %33 {strides = array<i32>} : memref<128x1xf32, #tpu.memory_space<vmem>>, vector<128x1xf32>,
    %c0_19 = arith.constant 0 : index
    %c0_20 = arith.constant 0 : index
    %35 = vector.load %arg16[%c0_19, %c0_20] : memref<128x16xf32, #tpu.memory_space<vmem>>, vector<128x16xf32>
    %36 = vector.broadcast %25 : vector<128x1xf32> to vector<128x16xf32>
    %37 = arith.mulf %36, %35 : vector<128x16xf32>
    %cst_21 = arith.constant dense<0.000000e+00> : vector<128x16xf32>
    %38 = tpu.matmul %28, %4, %cst_21 {dimension_numbers = #tpu.dot_dimension_numbers<[1], [0], [0], [1], [0, 0, 1, 1], [], []>} : vector<128x128xf32>, vector<128x16xf32>, vector<128x16xf32> -> vector<128x16xf32>
    %39 = arith.addf %37, %38 : vector<128x16xf32>
    %c0_22 = arith.constant 0 : index
    %c0_23 = arith.constant 0 : index
    %40 = vector.load %arg16[%c0_22, %c0_23] : memref<128x16xf32, #tpu.memory_space<vmem>>, vector<128x16xf32>
    tpu.vector_store %arg16[%c0_22, %c0_23], %39 {strides = array<i32>} : memref<128x16xf32, #tpu.memory_space<vmem>>, vector<128x16xf32>,
    %c0_24 = arith.constant 0 : index
    %c0_25 = arith.constant 0 : index
    %41 = vector.load %arg14[%c0_24, %c0_25] : memref<128x1xf32, #tpu.memory_space<vmem>>, vector<128x1xf32>
    tpu.vector_store %arg14[%c0_24, %c0_25], %23 {strides = array<i32>} : memref<128x1xf32, #tpu.memory_space<vmem>>, vector<128x1xf32>,
    %c0_i32_26 = arith.constant 0 : i32
    %42 = arith.cmpi eq, %arg2, %c0_i32_26 : i32
    %43 = arith.extui %42 : i1 to i32
    %c0_i32_27 = arith.constant 0 : i32
    %44 = arith.cmpi ne, %43, %c0_i32_27 : i32
    scf.if %44 {
      %c0_28 = arith.constant 0 : index
      %c0_29 = arith.constant 0 : index
      %45 = vector.load %arg15[%c0_28, %c0_29] : memref<128x1xf32, #tpu.memory_space<vmem>>, vector<128x1xf32>
      %46 = tpu.reciprocal %45 {approx = true} : vector<128x1xf32> -> vector<128x1xf32>
      %c0_30 = arith.constant 0 : index
      %c0_31 = arith.constant 0 : index
      %47 = vector.load %arg16[%c0_30, %c0_31] : memref<128x16xf32, #tpu.memory_space<vmem>>, vector<128x16xf32>
      %48 = vector.broadcast %46 : vector<128x1xf32> to vector<128x16xf32>
      %49 = arith.mulf %47, %48 : vector<128x16xf32>
      %c0_32 = arith.constant 0 : index
      %c0_33 = arith.constant 0 : index
      %50 = vector.load %arg9[%c0_32, %c0_33] : memref<16x16xf32, #tpu.memory_space<vmem>>, vector<16x16xf32>
      %cst_34 = arith.constant dense<0.000000e+00> : vector<128x16xf32>
      %51 = tpu.matmul %49, %50, %cst_34 {dimension_numbers = #tpu.dot_dimension_numbers<[1], [0], [0], [1], [0, 0, 1, 1], [], []>} : vector<128x16xf32>, vector<16x16xf32>, vector<128x16xf32> -> vector<128x16xf32>
      %c0_35 = arith.constant 0 : index
      %c0_36 = arith.constant 0 : index
      %52 = vector.load %arg10[%c0_35, %c0_36] : memref<1x16xf32, #tpu.memory_space<vmem>>, vector<1x16xf32>
      %53 = vector.broadcast %52 : vector<1x16xf32> to vector<128x16xf32>
      %54 = arith.addf %51, %53 : vector<128x16xf32>
      %c0_37 = arith.constant 0 : index
      %55 = memref.load %arg11[%c0_37] : memref<1xf32, #tpu.memory_space<smem>>
      %56 = vector.broadcast %55 : f32 to vector<128x16xf32>
      %57 = arith.mulf %56, %54 : vector<128x16xf32>
      %c0_38 = arith.constant 0 : index
      %c0_39 = arith.constant 0 : index
      %c0_40 = arith.constant 0 : index
      %58 = vector.load %arg3[%c0_38, %c0_39, %c0_40] : memref<1x128x16xf32, #tpu.memory_space<vmem>>, vector<1x128x16xf32>
      %59 = vector.shape_cast %58 : vector<1x128x16xf32> to vector<128x16xf32>
      %60 = arith.addf %57, %59 : vector<128x16xf32>
      %c0_41 = arith.constant 0 : index
      %c0_42 = arith.constant 0 : index
      %c0_43 = arith.constant 0 : index
      %61 = vector.load %arg12[%c0_41, %c0_42, %c0_43] : memref<1x128x16xf32, #tpu.memory_space<vmem>>, vector<1x128x16xf32>
      %62 = vector.shape_cast %61 : vector<1x128x16xf32> to vector<128x16xf32>
      %63 = vector.shape_cast %60 : vector<128x16xf32> to vector<1x128x16xf32>
      tpu.vector_store %arg12[%c0_41, %c0_42, %c0_43], %63 {strides = array<i32>} : memref<1x128x16xf32, #tpu.memory_space<vmem>>, vector<1x128x16xf32>,
    } else {
    }
    return
  }
  func.func @transform_0(%arg0: i32, %arg1: i32, %arg2: i32) -> (i32, i32, i32) {
    %c0_i32 = arith.constant 0 : i32
    %c0_i32_0 = arith.constant 0 : i32
    return %arg0, %arg1, %c0_i32 : i32, i32, i32
  }
  func.func @transform_1(%arg0: i32, %arg1: i32, %arg2: i32) -> (i32, i32, i32) {
    %c0_i32 = arith.constant 0 : i32
    %c0_i32_0 = arith.constant 0 : i32
    return %arg0, %arg2, %c0_i32 : i32, i32, i32
  }
  func.func @transform_2(%arg0: i32, %arg1: i32, %arg2: i32) -> (i32, i32) {
    %c0_i32 = arith.constant 0 : i32
    %c0_i32_0 = arith.constant 0 : i32
    %c0_i32_1 = arith.constant 0 : i32
    return %c0_i32, %c0_i32_0 : i32, i32
  }
  func.func @transform_3(%arg0: i32, %arg1: i32, %arg2: i32) -> (i32, i32) {
    %c0_i32 = arith.constant 0 : i32
    %c0_i32_0 = arith.constant 0 : i32
    %c0_i32_1 = arith.constant 0 : i32
    return %c0_i32, %c0_i32_0 : i32, i32
  }
  func.func @transform_4(%arg0: i32, %arg1: i32, %arg2: i32) -> (i32, i32) {
    %c0_i32 = arith.constant 0 : i32
    %c0_i32_0 = arith.constant 0 : i32
    %c0_i32_1 = arith.constant 0 : i32
    return %c0_i32, %c0_i32_0 : i32, i32
  }
  func.func @transform_5(%arg0: i32, %arg1: i32, %arg2: i32) -> (i32, i32) {
    %c0_i32 = arith.constant 0 : i32
    %c0_i32_0 = arith.constant 0 : i32
    %c0_i32_1 = arith.constant 0 : i32
    return %c0_i32, %c0_i32_0 : i32, i32
  }
  func.func @transform_6(%arg0: i32, %arg1: i32, %arg2: i32) -> (i32, i32) {
    %c0_i32 = arith.constant 0 : i32
    %c0_i32_0 = arith.constant 0 : i32
    %c0_i32_1 = arith.constant 0 : i32
    return %c0_i32, %c0_i32_0 : i32, i32
  }
  func.func @transform_7(%arg0: i32, %arg1: i32, %arg2: i32) -> (i32, i32) {
    %c0_i32 = arith.constant 0 : i32
    %c0_i32_0 = arith.constant 0 : i32
    %c0_i32_1 = arith.constant 0 : i32
    return %c0_i32, %c0_i32_0 : i32, i32
  }
  func.func @transform_8(%arg0: i32, %arg1: i32, %arg2: i32) -> i32 {
    %c0_i32 = arith.constant 0 : i32
    %c0_i32_0 = arith.constant 0 : i32
    return %c0_i32 : i32
  }
  func.func @transform_9(%arg0: i32, %arg1: i32, %arg2: i32) -> (i32, i32, i32) {
    %c0_i32 = arith.constant 0 : i32
    %c0_i32_0 = arith.constant 0 : i32
    return %arg0, %arg1, %c0_i32 : i32, i32, i32
  }
}

</mosaic_0001>

<bundles_post_ra>
// kernel: tpu_custom_call.1
= control target key start
LH: loop header
LB: loop body
LE: loop exit
PB: predicated region body
PF: predicated region fallthrough
CT: control target
= control target key end

     0   :  { %s2987_s11 = smov 0   ;;  %s2989_s12 = smov 0   ;;  %s3801_s0 = inlined_call_operand.vmem [shape: f32[2,128,16], index: 0, kind: input, shape index: {}]   ;;  %s3802_s1 = inlined_call_operand.vmem [shape: f32[2,128,16], index: 1, kind: input, shape index: {}]   ;;  %s3803_s2 = inlined_call_operand.vmem [shape: f32[16,2], index: 2, kind: input, shape index: {}]   ;;  %s3804_s3 = inlined_call_operand.vmem [shape: f32[1,2], index: 3, kind: input, shape index: {}]   ;;  %s3805_s4 = inlined_call_operand.vmem [shape: f32[16,2], index: 4, kind: input, shape index: {}]   ;;  %s3806_s5 = inlined_call_operand.vmem [shape: f32[1,2], index: 5, kind: input, shape index: {}]   ;;  %s3807_s6 = inlined_call_operand.vmem [shape: f32[16,16], index: 6, kind: input, shape index: {}]   ;;  %s3808_s7 = inlined_call_operand.vmem [shape: f32[1,16], index: 7, kind: input, shape index: {}]   ;;  %s3809_s8 = inlined_call_operand.<no memory space> [shape: f32[1], index: 8, kind: input, shape index: {}]   ;;  %s3810_s9 = inlined_call_operand.vmem [shape: f32[2,128,16], index: 9, kind: output, shape index: {}]  }
   0x1   :  { %14 = sst [smem:[#allocation6]] %s3809_s8  ;;  %s2991_s13 = smov 0  }
   0x2 LB: > { %s39_s8 = sadd.s32 1, %s2925_s12  ;;  %p2373_p0 = scmp.ge.s32.totalorder %s2929_s13, 1  ;;  %s2929_s13 = sphi %s2991_s13, %s20_s13   ;;  %s2925_s12 = sphi %s2989_s12, %s3825_s12   ;;  %s2921_s11 = sphi %s2987_s11, %s3824_s11  }
   0x3   : > { %p41_p1 = scmp.ge.s32.totalorder %s39_s8, 2  ;;  %p333_p2 = scmp.lt.s32.totalorder %s2929_s13, 3 }
   0x5   : > { %s3827_s8 = smov (%p41_p1, %s39_s8), 0  ;;  %p334_p3 = pnand %p2373_p0, %p333_p2 }
   0x6   : > { %p387_p4 = scmp.lt.s32.totalorder (!%p334_p3), %s2921_s11, 1  ;;  %s2195_s18 = sld [smem:[#allocation6]] (!%p334_p3) }
   0x7   : > { %337 = sbr.rel (%p334_p3) target bundleno = 1325 (0x52d), region = 56 }
   0xc   : > { %v722_v0 = vld [vmem:[%s3805_s4 + $0x8] sm:$0xff]  ;;  %v721_v1 = vld [vmem:[%s3805_s4] sm:$0xff]  ;;  %s3829_s11 = smov (!%p387_p4, %s2921_s11), 1  ;;  %vm445_vm0 = vcmask 130048   ;;  %vm639_vm1 = vcmask 15360   ;;  %vm656_vm2 = vcmask 7168  }
   0xd   : > { %v437_v2 = vld [vmem:[%s3803_s2 + $0x8] sm:$0xff]  ;;  %2614 = vmatprep.subr.mxu1 %v722_v0  ;;  %v436_v3 = vld [vmem:[%s3803_s2] sm:$0xff]  ;;  %s3017_s22 = sshll.u32 %s3829_s11, 7 }
   0xe   : > { %2586 = vmatprep.subr.mxu0 %v437_v2  ;;  %2615 = vmatpush3.msra.mxu1 %v722_v0  ;;  %s3023_s25 = scalar_lea.vmem %s3802_s1, %s3017_s22  ;;  %s3040_s28 = scalar_lea.vmem %s3801_s0, %s3017_s22  ;;  %v3137_v38 = vld [vmem:[%s3804_s3] ss:$0 sm:$0xff] }
   0xf   : > { %2587 = vmatpush3.msra.mxu0 %v437_v2  ;;  %2616 = vmatprep.subr.mxu1 %v721_v1  ;;  %v3026_v4 = vld [vmem:[%s3023_s25] sm:$0xff]  ;;  %v3029_v5 = vld [vmem:[%s3023_s25 + $0x8] sm:$0xff]  ;;  %v3032_v6 = vld [vmem:[%s3023_s25 + $0x10] sm:$0xff]  ;;  %s3714_s24 = scalar_lea.vmem %s3810_s9, %s3017_s22 }
  0x10   : > { %2588 = vmatprep.subr.mxu0 %v436_v3  ;;  %2617 = vmatpush3.msra.mxu1 %v721_v1  ;;  %v3047_v7 = vld [vmem:[%s3023_s25 + $0x18] sm:$0xff]  ;;  %v3050_v8 = vld [vmem:[%s3023_s25 + $0x20] sm:$0xff]  ;;  %v421_v10 = vld [vmem:[%s3040_s28 + $0x8] sm:$0xff] }
  0x11   : > { %2589 = vmatpush3.msra.mxu0 %v436_v3  ;;  %2618 = vmatprep.mubr.msk.f32.mxu1 %vm445_vm0, %v3026_v4  ;;  %v420_v9 = vld [vmem:[%s3040_s28] sm:$0xff]  ;;  %v422_v11 = vld [vmem:[%s3040_s28 + $0x10] sm:$0xff]  ;;  %v3061_v12 = vld [vmem:[%s3023_s25 + $0x28] sm:$0xff] }
  0x12   : > { %2619 = vmatmul.mubr.msk.f32.vlgmr.msra.gmra.mxu1 %vm445_vm0, %v3029_v5  ;;  %2590 = vmatprep.mubr.msk.f32.mxu0 %vm445_vm0, %v420_v9  ;;  %v720_v13 = vld [vmem:[%s3023_s25 + $0x78] sm:$0xff]  ;;  %v3066_v14 = vld [vmem:[%s3023_s25 + $0x30] sm:$0xff]  ;;  %v424_v17 = vld [vmem:[%s3040_s28 + $0x20] sm:$0xff] }
  0x13   : > { %2621 = vmatprep.mubr.msk.f32.mxu1 %vm445_vm0, %v3032_v6  ;;  %2591 = vmatmul.mubr.msk.f32.vlgmr.msra.gmra.mxu0 %vm445_vm0, %v421_v10  ;;  %v423_v15 = vld [vmem:[%s3040_s28 + $0x18] sm:$0xff]  ;;  %v719_v16 = vld [vmem:[%s3023_s25 + $0x70] sm:$0xff]  ;;  %v713_v19 = vld [vmem:[%s3023_s25 + $0x40] sm:$0xff] }
  0x14   : > { %2593 = vmatprep.mubr.msk.f32.mxu0 %vm445_vm0, %v422_v11  ;;  %2698 = vmatprep.subr.mxu1 %v720_v13  ;;  %v712_v18 = vld [vmem:[%s3023_s25 + $0x38] sm:$0xff]  ;;  %v718_v20 = vld [vmem:[%s3023_s25 + $0x68] sm:$0xff]  ;;  %v426_v22 = vld [vmem:[%s3040_s28 + $0x30] sm:$0xff] }
  0x15   : > { %2699 = vmatpush3.msra.mxu1 %v720_v13  ;;  %v425_v21 = vld [vmem:[%s3040_s28 + $0x28] sm:$0xff]  ;;  %v715_v24 = vld [vmem:[%s3023_s25 + $0x50] sm:$0xff]  ;;  %v717_v25 = vld [vmem:[%s3023_s25 + $0x60] sm:$0xff] }
  0x16   : > { %2622 = vmatmul.mubr.msk.f32.gmra.mxu1 %vm445_vm0, %v3047_v7  ;;  %2700 = vmatprep.subr.mxu1 %v719_v16  ;;  %v714_v23 = vld [vmem:[%s3023_s25 + $0x48] sm:$0xff]  ;;  %v427_v26 = vld [vmem:[%s3040_s28 + $0x38] sm:$0xff]  ;;  %v428_v27 = vld [vmem:[%s3040_s28 + $0x40] sm:$0xff] }
  0x17   : > { %2624 = vmatprep.mubr.msk.f32.mxu1 %vm445_vm0, %v3050_v8  ;;  %2594 = vmatmul.mubr.msk.f32.gmra.mxu0 %vm445_vm0, %v423_v15  ;;  %v716_v28 = vld [vmem:[%s3023_s25 + $0x58] sm:$0xff]  ;;  %v429_v29 = vld [vmem:[%s3040_s28 + $0x48] sm:$0xff]  ;;  %v430_v30 = vld [vmem:[%s3040_s28 + $0x50] sm:$0xff] }
  0x18   : > { %2596 = vmatprep.mubr.msk.f32.mxu0 %vm445_vm0, %v424_v17  ;;  %2701 = vmatpush3.msra.mxu1 %v719_v16  ;;  %v431_v31 = vld [vmem:[%s3040_s28 + $0x58] sm:$0xff]  ;;  %v432_v32 = vld [vmem:[%s3040_s28 + $0x60] sm:$0xff]  ;;  %v433_v33 = vld [vmem:[%s3040_s28 + $0x68] sm:$0xff] }
  0x19   : > { %2702 = vmatprep.subr.mxu1 %v718_v20  ;;  %v434_v34 = vld [vmem:[%s3040_s28 + $0x70] sm:$0xff]  ;;  %v435_v35 = vld [vmem:[%s3040_s28 + $0x78] sm:$0xff]  ;;  %v2397_v11 = vld [vmem:[%s3806_s5] ss:$0 sm:$0xff] }
  0x1a   : > { %2625 = vmatmul.mubr.msk.f32.gmra.mxu1 %vm445_vm0, %v3061_v12 }
  0x1b   : > { %2627 = vmatprep.mubr.msk.f32.mxu1 %vm445_vm0, %v3066_v14  ;;  %2597 = vmatmul.mubr.msk.f32.gmra.mxu0 %vm445_vm0, %v425_v21 }
  0x1c   : > { %2599 = vmatprep.mubr.msk.f32.mxu0 %vm445_vm0, %v426_v22  ;;  %2703 = vmatpush3.msra.mxu1 %v718_v20 }
  0x1d   : > { %2704 = vmatprep.subr.mxu1 %v717_v25 }
  0x1e   : > { %2628 = vmatmul.mubr.msk.f32.gmra.mxu1 %vm445_vm0, %v712_v18 }
  0x1f   : > { %2630 = vmatprep.mubr.msk.f32.mxu1 %vm445_vm0, %v713_v19  ;;  %2600 = vmatmul.mubr.msk.f32.gmra.mxu0 %vm445_vm0, %v427_v26 }
  0x20   : > { %2602 = vmatprep.mubr.msk.f32.mxu0 %vm445_vm0, %v428_v27  ;;  %2705 = vmatpush3.msra.mxu1 %v717_v25 }
  0x21   : > { %2706 = vmatprep.subr.mxu1 %v716_v28 }
  0x22   : > { %2631 = vmatmul.mubr.msk.f32.gmra.mxu1 %vm445_vm0, %v714_v23 }
  0x23   : > { %2633 = vmatprep.mubr.msk.f32.mxu1 %vm445_vm0, %v715_v24  ;;  %2603 = vmatmul.mubr.msk.f32.gmra.mxu0 %vm445_vm0, %v429_v29 }
  0x24   : > { %2605 = vmatprep.mubr.msk.f32.mxu0 %vm445_vm0, %v430_v30  ;;  %2707 = vmatpush3.msra.mxu1 %v716_v28 }
  0x25   : > { %2708 = vmatprep.subr.mxu1 %v715_v24 }
  0x26   : > { %2634 = vmatmul.mubr.msk.f32.gmra.mxu1 %vm445_vm0, %v716_v28 }
  0x27   : > { %2636 = vmatprep.mubr.msk.f32.mxu1 %vm445_vm0, %v717_v25  ;;  %2606 = vmatmul.mubr.msk.f32.gmra.mxu0 %vm445_vm0, %v431_v31 }
  0x28   : > { %2608 = vmatprep.mubr.msk.f32.mxu0 %vm445_vm0, %v432_v32  ;;  %2709 = vmatpush3.msra.mxu1 %v715_v24 }
  0x29   : > { %2710 = vmatprep.subr.mxu1 %v714_v23 }
  0x2a   : > { %2637 = vmatmul.mubr.msk.f32.gmra.mxu1 %vm445_vm0, %v718_v20 }
  0x2b   : > { %2639 = vmatprep.mubr.msk.f32.mxu1 %vm445_vm0, %v719_v16  ;;  %2609 = vmatmul.mubr.msk.f32.gmra.mxu0 %vm445_vm0, %v433_v33 }
  0x2c   : > { %2711 = vmatpush3.msra.mxu1 %v714_v23  ;;  %2611 = vmatprep.mubr.msk.f32.mxu0 %vm445_vm0, %v434_v34 }
  0x2d   : > { %2712 = vmatprep.subr.mxu1 %v713_v19 }
  0x2e   : > { %2640 = vmatmul.mubr.msk.f32.gmra.mxu1 %vm445_vm0, %v720_v13 }
  0x2f   : > { %2713 = vmatpush3.msra.mxu1 %v713_v19  ;;  %2612 = vmatmul.mubr.msk.f32.gmra.mxu0 %vm445_vm0, %v435_v35 }
  0x30   : > { %2714 = vmatprep.subr.mxu1 %v712_v18 }
  0x31   : > { %2715 = vmatpush3.msra.mxu1 %v712_v18 }
  0x32   : > { %2716 = vmatprep.subr.mxu1 %v3066_v14 }
  0x33   : > { %2717 = vmatpush3.msra.mxu1 %v3066_v14 }
  0x34   : > { %2718 = vmatprep.subr.mxu1 %v3061_v12 }
  0x35   : > { %2719 = vmatpush3.msra.mxu1 %v3061_v12 }
  0x36   : > { %2720 = vmatprep.subr.mxu1 %v3050_v8 }
  0x37   : > { %2721 = vmatpush3.msra.mxu1 %v3050_v8 }
  0x38   : > { %2722 = vmatprep.subr.mxu1 %v3047_v7 }
  0x39   : > { %2723 = vmatpush3.msra.mxu1 %v3047_v7 }
  0x3a   : > { %2724 = vmatprep.subr.mxu1 %v3032_v6 }
  0x3b   : > { %2725 = vmatpush3.msra.mxu1 %v3032_v6 }
  0x3c   : > { %2726 = vmatprep.subr.mxu1 %v3029_v5 }
  0x3d   : > { %2727 = vmatpush3.msra.mxu1 %v3029_v5 }
  0x3e   : > { %2728 = vmatprep.subr.mxu1 %v3026_v4 }
  0x3f   : > { %2729 = vmatpush3.msra.mxu1 %v3026_v4 }
  0xd2   : > { %v3130_v36 = vpop.f32.mrf.mxu1 }
  0xd3   : > { %v2592_v40 = vpop.f32.mrf.mxu0 }
  0xd4   : > { %v3132_v37 = vpop.f32.mrf.mxu1  ;;  %v566_v42 = vadd.f32 %v2592_v40, %v3137_v38  ;;  %v851_v40 = vadd.f32 %v3130_v36, %v2397_v11 }
  0xd5   : > { %v560_v43 = vpop.f32.mrf.mxu0 }
  0xd6   : > { %v3139_v39 = vpop.f32.mrf.mxu1  ;;  %641 = vst.msk [vmem:[#allocation2 + $0x8] sm:$0xff] %vm639_vm1, %v566_v42  ;;  %v561_v45 = vadd.f32 %v3137_v38, %v560_v43  ;;  %v846_v42 = vadd.f32 %v2397_v11, %v3132_v37 }
  0xd7   : > { %v2595_v46 = vpop.f32.mrf.mxu0  ;;  %v861_v35 = vadd.f32 %v3139_v39, %v2397_v11 }
  0xd8   : > { %v3141_v41 = vpop.f32.mrf.mxu1  ;;  %640 = vst.msk [vmem:[#allocation2] sm:$0xff] %vm639_vm1, %v561_v45  ;;  %v576_v48 = vadd.f32 %v2595_v46, %v3137_v38 }
  0xd9   : > { %v570_v49 = vpop.f32.mrf.mxu0 }
  0xda   : > { %v3144_v44 = vpop.f32.mrf.mxu1  ;;  %643 = vst.msk [vmem:[#allocation2 + $0x18] sm:$0xff] %vm639_vm1, %v576_v48  ;;  %v571_v51 = vadd.f32 %v3137_v38, %v570_v49 }
  0xdb   : > { %v2598_v52 = vpop.f32.mrf.mxu0  ;;  %v871_v33 = vadd.f32 %v3144_v44, %v2397_v11 }
  0xdc   : > { %v3148_v47 = vpop.f32.mrf.mxu1  ;;  %642 = vst.msk [vmem:[#allocation2 + $0x10] sm:$0xff] %vm639_vm1, %v571_v51  ;;  %v586_v54 = vadd.f32 %v2598_v52, %v3137_v38 }
  0xdd   : > { %v580_v55 = vpop.f32.mrf.mxu0  ;;  %v866_v34 = vadd.f32 %v2397_v11, %v3148_v47 }
  0xde   : > { %v3152_v50 = vpop.f32.mrf.mxu1  ;;  %645 = vst.msk [vmem:[#allocation2 + $0x28] sm:$0xff] %vm639_vm1, %v586_v54  ;;  %v581_v57 = vadd.f32 %v3137_v38, %v580_v55  ;;  %v2931_v54 = vmov -inf   ;;  %v1183_v55 = vlaneseq }
  0xdf   : > { %v924_v58 = vld [vmem:[#allocation2] sm:$0xff]  ;;  %v2601_v59 = vpop.f32.mrf.mxu0  ;;  %v881_v31 = vadd.f32 %v3152_v50, %v2397_v11  ;;  %657 = vst.msk [vmem:[#allocation3] sm:$0xff] %vm656_vm2, %v2931_v54  ;;  %658 = vst.msk [vmem:[#allocation3 + $0x8] sm:$0xff] %vm656_vm2, %v2931_v54 }
  0xe0   : > { %v3156_v53 = vpop.f32.mrf.mxu1  ;;  %2674 = vmatprep.mubr.msk.f32.mxu0 %vm639_vm1, %v924_v58  ;;  %644 = vst.msk [vmem:[#allocation2 + $0x20] sm:$0xff] %vm639_vm1, %v581_v57  ;;  %v596_v61 = vadd.f32 %v2601_v59, %v3137_v38 }
  0xe1   : > { %v590_v62 = vpop.f32.mrf.mxu0  ;;  %v876_v32 = vadd.f32 %v2397_v11, %v3156_v53  ;;  %v927_v43 = vld [vmem:[#allocation2 + $0x18] sm:$0xff]  ;;  %659 = vst.msk [vmem:[#allocation3 + $0x10] sm:$0xff] %vm656_vm2, %v2931_v54  ;;  %660 = vst.msk [vmem:[#allocation3 + $0x18] sm:$0xff] %vm656_vm2, %v2931_v54 }
  0xe2   : > { %v2632_v56 = vpop.f32.mrf.mxu1  ;;  %647 = vst.msk [vmem:[#allocation2 + $0x38] sm:$0xff] %vm639_vm1, %v596_v61  ;;  %v591_v0 = vadd.f32 %v3137_v38, %v590_v62 }
  0xe3   : > { %v2604_v1 = vpop.f32.mrf.mxu0  ;;  %v891_v29 = vadd.f32 %v2632_v56, %v2397_v11  ;;  %v926_v39 = vld [vmem:[#allocation2 + $0x10] sm:$0xff]  ;;  %661 = vst.msk [vmem:[#allocation3 + $0x20] sm:$0xff] %vm656_vm2, %v2931_v54  ;;  %662 = vst.msk [vmem:[#allocation3 + $0x28] sm:$0xff] %vm656_vm2, %v2931_v54  ;;  %v3258_v56 = vand.u32 127, %v1183_v55 }
  0xe4   : > { %v885_v60 = vpop.f32.mrf.mxu1  ;;  %646 = vst.msk [vmem:[#allocation2 + $0x30] sm:$0xff] %vm639_vm1, %v591_v0  ;;  %v606_v3 = vadd.f32 %v2604_v1, %v3137_v38 }
  0xe5   : > { %v600_v4 = vpop.f32.mrf.mxu0  ;;  %v886_v30 = vadd.f32 %v2397_v11, %v885_v60  ;;  %v929_v44 = vld [vmem:[#allocation2 + $0x28] sm:$0xff]  ;;  %663 = vst.msk [vmem:[#allocation3 + $0x30] sm:$0xff] %vm656_vm2, %v2931_v54  ;;  %664 = vst.msk [vmem:[#allocation3 + $0x38] sm:$0xff] %vm656_vm2, %v2931_v54  ;;  %vm1187_vm3 = vcmp.lt.s32.totalorder %v3258_v56, 64 }
  0xe6   : > { %v2635_v63 = vpop.f32.mrf.mxu1  ;;  %649 = vst.msk [vmem:[#allocation2 + $0x48] sm:$0xff] %vm639_vm1, %v606_v3  ;;  %v601_v6 = vadd.f32 %v3137_v38, %v600_v4 }
  0xe7   : > { %v2607_v7 = vpop.f32.mrf.mxu0  ;;  %v901_v27 = vadd.f32 %v2635_v63, %v2397_v11  ;;  %v928_v36 = vld [vmem:[#allocation2 + $0x20] sm:$0xff]  ;;  %665 = vst.msk [vmem:[#allocation3 + $0x40] sm:$0xff] %vm656_vm2, %v2931_v54  ;;  %666 = vst.msk [vmem:[#allocation3 + $0x48] sm:$0xff] %vm656_vm2, %v2931_v54 }
  0xe8   : > { %v895_v2 = vpop.f32.mrf.mxu1  ;;  %648 = vst.msk [vmem:[#allocation2 + $0x40] sm:$0xff] %vm639_vm1, %v601_v6  ;;  %v616_v9 = vadd.f32 %v2607_v7, %v3137_v38 }
  0xe9   : > { %v610_v10 = vpop.f32.mrf.mxu0  ;;  %v896_v28 = vadd.f32 %v2397_v11, %v895_v2  ;;  %v931_v45 = vld [vmem:[#allocation2 + $0x38] sm:$0xff]  ;;  %667 = vst.msk [vmem:[#allocation3 + $0x50] sm:$0xff] %vm656_vm2, %v2931_v54  ;;  %668 = vst.msk [vmem:[#allocation3 + $0x58] sm:$0xff] %vm656_vm2, %v2931_v54 }
  0xea   : > { %v2638_v5 = vpop.f32.mrf.mxu1  ;;  %651 = vst.msk [vmem:[#allocation2 + $0x58] sm:$0xff] %vm639_vm1, %v616_v9  ;;  %v611_v13 = vadd.f32 %v3137_v38, %v610_v10  ;;  %v2932_v9 = vmov 0  }
  0xeb   : > { %v2610_v15 = vpop.f32.mrf.mxu0  ;;  %v911_v23 = vadd.f32 %v2638_v5, %v2397_v11  ;;  %v930_v37 = vld [vmem:[#allocation2 + $0x30] sm:$0xff]  ;;  %669 = vst.msk [vmem:[#allocation3 + $0x60] sm:$0xff] %vm656_vm2, %v2931_v54  ;;  %670 = vst.msk [vmem:[#allocation3 + $0x68] sm:$0xff] %vm656_vm2, %v2931_v54  ;;  %2809 = vset.pattern.permute.xlu0 %v2932_v9  ;;  %2810 = vset.pattern.permute.xlu1 %v2932_v9 }
  0xec   : > { %v905_v8 = vpop.f32.mrf.mxu1  ;;  %650 = vst.msk [vmem:[#allocation2 + $0x50] sm:$0xff] %vm639_vm1, %v611_v13  ;;  %v626_v17 = vadd.f32 %v2610_v15, %v3137_v38 }
  0xed   : > { %v620_v19 = vpop.f32.mrf.mxu0  ;;  %v906_v26 = vadd.f32 %v2397_v11, %v905_v8  ;;  %v933_v47 = vld [vmem:[#allocation2 + $0x48] sm:$0xff]  ;;  %671 = vst.msk [vmem:[#allocation3 + $0x70] sm:$0xff] %vm656_vm2, %v2931_v54  ;;  %672 = vst.msk [vmem:[#allocation3 + $0x78] sm:$0xff] %vm656_vm2, %v2931_v54 }
  0xee   : > { %v2641_v12 = vpop.f32.mrf.mxu1  ;;  %653 = vst.msk [vmem:[#allocation2 + $0x68] sm:$0xff] %vm639_vm1, %v626_v17  ;;  %v621_v20 = vadd.f32 %v3137_v38, %v620_v19  ;;  %v3437_v56 = vld [vmem:[#allocation3 + $0x40] sm:$0xff] }
  0xef   : > { %v921_v14 = vadd.f32 %v2641_v12, %v2397_v11  ;;  %v2613_v21 = vpop.f32.mrf.mxu0  ;;  %v932_v46 = vld [vmem:[#allocation2 + $0x40] sm:$0xff] }
  0xf0   : > { %v915_v16 = vpop.f32.mrf.mxu1  ;;  %652 = vst.msk [vmem:[#allocation2 + $0x60] sm:$0xff] %vm639_vm1, %v621_v20  ;;  %v636_v22 = vadd.f32 %v2613_v21, %v3137_v38 }
  0xf1   : > { %v916_v18 = vadd.f32 %v2397_v11, %v915_v16  ;;  %2642 = vmatprep.subr.msk.mxu0 %vm639_vm1, %v921_v14  ;;  %v630_v24 = vpop.f32.mrf.mxu0  ;;  %v935_v49 = vld [vmem:[#allocation2 + $0x58] sm:$0xff] }
  0xf2   : > { %2643 = vmatpush3.xpose.msk.msra.mxu0 %vm639_vm1, %v921_v14  ;;  %655 = vst.msk [vmem:[#allocation2 + $0x78] sm:$0xff] %vm639_vm1, %v636_v22  ;;  %v631_v25 = vadd.f32 %v3137_v38, %v630_v24  ;;  %v856_v38 = vadd.f32 %v2397_v11, %v3141_v41  ;;  %v925_v41 = vld [vmem:[#allocation2 + $0x8] sm:$0xff]  ;;  %v2933_v22 = vmov 0.0  }
  0xf3   : > { %2644 = vmatprep.subr.msk.mxu0 %vm639_vm1, %v916_v18  ;;  %v934_v48 = vld [vmem:[#allocation2 + $0x50] sm:$0xff]  ;;  %673 = vst.msk [vmem:[#allocation4] sm:$0xff] %vm656_vm2, %v2933_v22  ;;  %674 = vst.msk [vmem:[#allocation4 + $0x8] sm:$0xff] %vm656_vm2, %v2933_v22 }
  0xf4   : > { %654 = vst.msk [vmem:[#allocation2 + $0x70] sm:$0xff] %vm639_vm1, %v631_v25 }
  0xf5   : > { %v937_v51 = vld [vmem:[#allocation2 + $0x68] sm:$0xff]  ;;  %675 = vst.msk [vmem:[#allocation4 + $0x10] sm:$0xff] %vm656_vm2, %v2933_v22  ;;  %676 = vst.msk [vmem:[#allocation4 + $0x18] sm:$0xff] %vm656_vm2, %v2933_v22 }
  0xf6   : > { %2645 = vmatpush3.xpose.msk.msra.mxu0 %vm639_vm1, %v916_v18  ;;  %677 = vst.msk [vmem:[#allocation4 + $0x20] sm:$0xff] %vm656_vm2, %v2933_v22  ;;  %678 = vst.msk [vmem:[#allocation4 + $0x28] sm:$0xff] %vm656_vm2, %v2933_v22 }
  0xf7   : > { %2646 = vmatprep.subr.msk.mxu0 %vm639_vm1, %v911_v23  ;;  %v936_v50 = vld [vmem:[#allocation2 + $0x60] sm:$0xff]  ;;  %679 = vst.msk [vmem:[#allocation4 + $0x30] sm:$0xff] %vm656_vm2, %v2933_v22  ;;  %680 = vst.msk [vmem:[#allocation4 + $0x38] sm:$0xff] %vm656_vm2, %v2933_v22 }
  0xf8   : > { %681 = vst.msk [vmem:[#allocation4 + $0x40] sm:$0xff] %vm656_vm2, %v2933_v22  ;;  %682 = vst.msk [vmem:[#allocation4 + $0x48] sm:$0xff] %vm656_vm2, %v2933_v22 }
  0xf9   : > { %v939_v53 = vld [vmem:[#allocation2 + $0x78] sm:$0xff]  ;;  %683 = vst.msk [vmem:[#allocation4 + $0x50] sm:$0xff] %vm656_vm2, %v2933_v22  ;;  %684 = vst.msk [vmem:[#allocation4 + $0x58] sm:$0xff] %vm656_vm2, %v2933_v22 }
  0xfa   : > { %2647 = vmatpush3.xpose.msk.msra.mxu0 %vm639_vm1, %v911_v23  ;;  %685 = vst.msk [vmem:[#allocation4 + $0x60] sm:$0xff] %vm656_vm2, %v2933_v22  ;;  %686 = vst.msk [vmem:[#allocation4 + $0x68] sm:$0xff] %vm656_vm2, %v2933_v22 }
  0xfb   : > { %2648 = vmatprep.subr.msk.mxu0 %vm639_vm1, %v906_v26  ;;  %v938_v52 = vld [vmem:[#allocation2 + $0x70] sm:$0xff]  ;;  %687 = vst.msk [vmem:[#allocation4 + $0x70] sm:$0xff] %vm656_vm2, %v2933_v22  ;;  %688 = vst.msk [vmem:[#allocation4 + $0x78] sm:$0xff] %vm656_vm2, %v2933_v22 }
  0xfc   : > { %689 = vst.msk [vmem:[#allocation5] sm:$0xff] %vm445_vm0, %v2933_v22  ;;  %690 = vst.msk [vmem:[#allocation5 + $0x8] sm:$0xff] %vm445_vm0, %v2933_v22 }
  0xfd   : > { %691 = vst.msk [vmem:[#allocation5 + $0x10] sm:$0xff] %vm445_vm0, %v2933_v22  ;;  %692 = vst.msk [vmem:[#allocation5 + $0x18] sm:$0xff] %vm445_vm0, %v2933_v22 }
  0xfe   : > { %2649 = vmatpush3.xpose.msk.msra.mxu0 %vm639_vm1, %v906_v26  ;;  %693 = vst.msk [vmem:[#allocation5 + $0x20] sm:$0xff] %vm445_vm0, %v2933_v22  ;;  %694 = vst.msk [vmem:[#allocation5 + $0x28] sm:$0xff] %vm445_vm0, %v2933_v22 }
  0xff   : > { %2650 = vmatprep.subr.msk.mxu0 %vm639_vm1, %v901_v27  ;;  %695 = vst.msk [vmem:[#allocation5 + $0x30] sm:$0xff] %vm445_vm0, %v2933_v22  ;;  %696 = vst.msk [vmem:[#allocation5 + $0x38] sm:$0xff] %vm445_vm0, %v2933_v22 }
 0x100   : > { %697 = vst.msk [vmem:[#allocation5 + $0x40] sm:$0xff] %vm445_vm0, %v2933_v22  ;;  %698 = vst.msk [vmem:[#allocation5 + $0x48] sm:$0xff] %vm445_vm0, %v2933_v22 }
 0x101   : > { %699 = vst.msk [vmem:[#allocation5 + $0x50] sm:$0xff] %vm445_vm0, %v2933_v22  ;;  %700 = vst.msk [vmem:[#allocation5 + $0x58] sm:$0xff] %vm445_vm0, %v2933_v22 }
 0x102   : > { %2651 = vmatpush3.xpose.msk.msra.mxu0 %vm639_vm1, %v901_v27  ;;  %701 = vst.msk [vmem:[#allocation5 + $0x60] sm:$0xff] %vm445_vm0, %v2933_v22  ;;  %702 = vst.msk [vmem:[#allocation5 + $0x68] sm:$0xff] %vm445_vm0, %v2933_v22  ;;  %v3373_v27 = vld [vmem:[#allocation3] sm:$0xff] }
 0x103   : > { %2652 = vmatprep.subr.msk.mxu0 %vm639_vm1, %v896_v28  ;;  %703 = vst.msk [vmem:[#allocation5 + $0x70] sm:$0xff] %vm445_vm0, %v2933_v22  ;;  %704 = vst.msk [vmem:[#allocation5 + $0x78] sm:$0xff] %vm445_vm0, %v2933_v22  ;;  %v3476_v22 = vld [vmem:[#allocation3 + $0x60] sm:$0xff] }
 0x106   : > { %2653 = vmatpush3.xpose.msk.msra.mxu0 %vm639_vm1, %v896_v28 }
 0x107   : > { %2654 = vmatprep.subr.msk.mxu0 %vm639_vm1, %v891_v29 }
 0x10a   : > { %2655 = vmatpush3.xpose.msk.msra.mxu0 %vm639_vm1, %v891_v29  ;;  %v3375_v29 = vld [vmem:[#allocation3 + $0x18] sm:$0xff] }
 0x10b   : > { %2656 = vmatprep.subr.msk.mxu0 %vm639_vm1, %v886_v30 }
 0x10e   : > { %2657 = vmatpush3.xpose.msk.msra.mxu0 %vm639_vm1, %v886_v30 }
 0x10f   : > { %2658 = vmatprep.subr.msk.mxu0 %vm639_vm1, %v881_v31 }
 0x112   : > { %2659 = vmatpush3.xpose.msk.msra.mxu0 %vm639_vm1, %v881_v31 }
 0x113   : > { %2660 = vmatprep.subr.msk.mxu0 %vm639_vm1, %v876_v32 }
 0x116   : > { %2661 = vmatpush3.xpose.msk.msra.mxu0 %vm639_vm1, %v876_v32  ;;  %v3380_v32 = vld [vmem:[#allocation3 + $0x8] sm:$0xff] }
 0x117   : > { %2662 = vmatprep.subr.msk.mxu0 %vm639_vm1, %v871_v33 }
 0x11a   : > { %2663 = vmatpush3.xpose.msk.msra.mxu0 %vm639_vm1, %v871_v33 }
 0x11b   : > { %2664 = vmatprep.subr.msk.mxu0 %vm639_vm1, %v866_v34 }
 0x11e   : > { %2665 = vmatpush3.xpose.msk.msra.mxu0 %vm639_vm1, %v866_v34 }
 0x11f   : > { %2666 = vmatprep.subr.msk.mxu0 %vm639_vm1, %v861_v35 }
 0x122   : > { %2667 = vmatpush3.xpose.msk.msra.mxu0 %vm639_vm1, %v861_v35 }
 0x123   : > { %2668 = vmatprep.subr.msk.mxu0 %vm639_vm1, %v856_v38 }
 0x126   : > { %2669 = vmatpush3.xpose.msk.msra.mxu0 %vm639_vm1, %v856_v38  ;;  %v3390_v38 = vld [vmem:[#allocation3 + $0x10] sm:$0xff] }
 0x127   : > { %2670 = vmatprep.subr.msk.mxu0 %vm639_vm1, %v851_v40 }
 0x12a   : > { %2671 = vmatpush3.xpose.msk.msra.mxu0 %vm639_vm1, %v851_v40 }
 0x12b   : > { %2672 = vmatprep.subr.msk.mxu0 %vm639_vm1, %v846_v42 }
 0x12e   : > { %2673 = vmatpush3.xpose.msk.msra.mxu0 %vm639_vm1, %v846_v42 }
 0x131   : > { %2675 = vmatmul.mubr.msk.f32.vlgmr.msra.gmra.mxu0 %vm639_vm1, %v925_v41  ;;  %v3399_v41 = vld [vmem:[#allocation3 + $0x20] sm:$0xff] }
 0x132   : > { %2677 = vmatprep.mubr.msk.f32.mxu0 %vm639_vm1, %v926_v39 }
 0x135   : > { %2678 = vmatmul.mubr.msk.f32.gmra.mxu0 %vm639_vm1, %v927_v43 }
 0x136   : > { %2680 = vmatprep.mubr.msk.f32.mxu0 %vm639_vm1, %v928_v36 }
 0x139   : > { %2681 = vmatmul.mubr.msk.f32.gmra.mxu0 %vm639_vm1, %v929_v44  ;;  %v3409_v44 = vld [vmem:[#allocation3 + $0x28] sm:$0xff] }
 0x13a   : > { %2683 = vmatprep.mubr.msk.f32.mxu0 %vm639_vm1, %v930_v37 }
 0x13d   : > { %2684 = vmatmul.mubr.msk.f32.gmra.mxu0 %vm639_vm1, %v931_v45 }
 0x13e   : > { %2686 = vmatprep.mubr.msk.f32.mxu0 %vm639_vm1, %v932_v46 }
 0x141   : > { %2687 = vmatmul.mubr.msk.f32.gmra.mxu0 %vm639_vm1, %v933_v47 }
 0x142   : > { %2689 = vmatprep.mubr.msk.f32.mxu0 %vm639_vm1, %v934_v48  ;;  %v3418_v48 = vld [vmem:[#allocation3 + $0x30] sm:$0xff] }
 0x145   : > { %2690 = vmatmul.mubr.msk.f32.gmra.mxu0 %vm639_vm1, %v935_v49 }
 0x146   : > { %2692 = vmatprep.mubr.msk.f32.mxu0 %vm639_vm1, %v936_v50 }
 0x149   : > { %2693 = vmatmul.mubr.msk.f32.gmra.mxu0 %vm639_vm1, %v937_v51  ;;  %v3428_v51 = vld [vmem:[#allocation3 + $0x38] sm:$0xff] }
 0x14a   : > { %2695 = vmatprep.mubr.msk.f32.mxu0 %vm639_vm1, %v938_v52 }
 0x14d   : > { %2696 = vmatmul.mubr.msk.f32.gmra.mxu0 %vm639_vm1, %v939_v53 }
 0x1f1   : > { %v2676_v57 = vpop.f32.mrf.mxu0 }
 0x1f2   : > { %v3273_v63 = vsel %vm1187_vm3, %v2676_v57, -1e+30 }
 0x1f3   : > { %v1103_v58 = vpop.f32.mrf.mxu0 }
 0x1f4   : > { %v3263_v59 = vsel %vm1187_vm3, %v1103_v58, -1e+30 }
 0x1f5   : > { %1220 = vmax.xlane.f32.xlu0 %v3263_v59  ;;  %v2679_v60 = vpop.f32.mrf.mxu0 }
 0x1f6   : > { %v3268_v61 = vsel %vm1187_vm3, %v2679_v60, -1e+30  ;;  %v3447_v60 = vld [vmem:[#allocation3 + $0x48] sm:$0xff] }
 0x1f7   : > { %1226 = vmax.xlane.f32.xlu1 %v3268_v61  ;;  %v1113_v62 = vpop.f32.mrf.mxu0 }
 0x1f8   : > { %v3277_v0 = vsel %vm1187_vm3, %v1113_v62, -1e+30 }
 0x1f9   : > { %1222 = vmax.xlane.f32.xlu0 %v3273_v63  ;;  %v2682_v1 = vpop.f32.mrf.mxu0 }
 0x1fa   : > { %v3283_v3 = vsel %vm1187_vm3, %v2682_v1, -1e+30 }
 0x1fb   : > { %1224 = vmax.xlane.f32.xlu1 %v3277_v0  ;;  %v1123_v2 = vpop.f32.mrf.mxu0 }
 0x1fc   : > { %v3287_v4 = vsel %vm1187_vm3, %v1123_v2, -1e+30 }
 0x1fd   : > { %v2685_v5 = vpop.f32.mrf.mxu0  ;;  %1228 = vmax.xlane.f32.xlu0 %v3287_v4 }
 0x1fe   : > { %v3293_v7 = vsel %vm1187_vm3, %v2685_v5, -1e+30 }
 0x1ff   : > { %1230 = vmax.xlane.f32.xlu1 %v3283_v3  ;;  %v1133_v6 = vpop.f32.mrf.mxu0 }
 0x200   : > { %v3297_v8 = vsel %vm1187_vm3, %v1133_v6, -1e+30  ;;  %v3456_v6 = vld [vmem:[#allocation3 + $0x50] sm:$0xff] }
 0x201   : > { %v2688_v10 = vpop.f32.mrf.mxu0  ;;  %1232 = vmax.xlane.f32.xlu0 %v3297_v8 }
 0x202   : > { %v3303_v12 = vsel %vm1187_vm3, %v2688_v10, -1e+30 }
 0x203   : > { %1234 = vmax.xlane.f32.xlu1 %v3293_v7  ;;  %v1143_v11 = vpop.f32.mrf.mxu0 }
 0x204   : > { %v3307_v13 = vsel %vm1187_vm3, %v1143_v11, -1e+30  ;;  %v3466_v11 = vld [vmem:[#allocation3 + $0x58] sm:$0xff] }
 0x205   : > { %v2691_v14 = vpop.f32.mrf.mxu0  ;;  %1236 = vmax.xlane.f32.xlu0 %v3307_v13 }
 0x206   : > { %v3313_v16 = vsel %vm1187_vm3, %v2691_v14, -1e+30 }
 0x207   : > { %1238 = vmax.xlane.f32.xlu1 %v3303_v12  ;;  %v1153_v15 = vpop.f32.mrf.mxu0 }
 0x208   : > { %v3317_v17 = vsel %vm1187_vm3, %v1153_v15, -1e+30 }
 0x209   : > { %v2694_v18 = vpop.f32.mrf.mxu0  ;;  %1240 = vmax.xlane.f32.xlu0 %v3317_v17 }
 0x20a   : > { %v3323_v20 = vsel %vm1187_vm3, %v2694_v18, -1e+30 }
 0x20b   : > { %1242 = vmax.xlane.f32.xlu1 %v3313_v16  ;;  %v1163_v19 = vpop.f32.mrf.mxu0 }
 0x20c   : > { %v3327_v21 = vsel %vm1187_vm3, %v1163_v19, -1e+30 }
 0x20d   : > { %v2697_v23 = vpop.f32.mrf.mxu0  ;;  %1244 = vmax.xlane.f32.xlu0 %v3327_v21 }
 0x20e   : > { %v3365_v25 = vsel %vm1187_vm3, %v2697_v23, -1e+30 }
 0x20f   : > { %1246 = vmax.xlane.f32.xlu1 %v3323_v20  ;;  %v1173_v24 = vpop.f32.mrf.mxu0 }
 0x210   : > { %v3369_v26 = vsel %vm1187_vm3, %v1173_v24, -1e+30 }
 0x211   : > { %1248 = vmax.xlane.f32.xlu0 %v3369_v26 }
 0x213   : > { %1250 = vmax.xlane.f32.xlu1 %v3365_v25 }
 0x27e   : > { %v1221_v28 = vpop.xlane.xlu0 %1220 }
 0x27f   : > { %v3378_v30 = vmax.f32 %v3373_v27, %v1221_v28  ;;  %v3486_v28 = vld [vmem:[#allocation3 + $0x68] sm:$0xff] }
 0x280   : > { %v1227_v31 = vpop.xlane.xlu1 %1226 }
 0x281   : > { %v1268_v33 = vsub.f32 %v3373_v27, %v3378_v30  ;;  %1830 = vst.msk [vmem:[#allocation3] sm:$0xff] %vm656_vm2, %v3378_v30  ;;  %v3387_v34 = vmax.f32 %v3375_v29, %v1227_v31  ;;  %1318 = vperm.xlu0 %2809, %v3378_v30  }
 0x282   : > { %v1223_v35 = vpop.xlane.xlu0 %1222 }
 0x283   : > { %1833 = vst.msk [vmem:[#allocation3 + $0x18] sm:$0xff] %vm656_vm2, %v3387_v34  ;;  %v3397_v42 = vmax.f32 %v3380_v32, %v1223_v35 }
 0x284   : > { %v1225_v39 = vpop.xlane.xlu1 %1224 }
 0x285   : > { %v1269_v43 = vsub.f32 %v3380_v32, %v3397_v42  ;;  %1831 = vst.msk [vmem:[#allocation3 + $0x8] sm:$0xff] %vm656_vm2, %v3397_v42  ;;  %v3406_v36 = vmax.f32 %v3390_v38, %v1225_v39  ;;  %1323 = vperm.xlu1 %2810, %v3397_v42  }
 0x286   : > { %v1229_v37 = vpop.xlane.xlu0 %1228 }
 0x287   : > { %v1270_v45 = vsub.f32 %v3390_v38, %v3406_v36  ;;  %1832 = vst.msk [vmem:[#allocation3 + $0x10] sm:$0xff] %vm656_vm2, %v3406_v36  ;;  %v3416_v46 = vmax.f32 %v3399_v41, %v1229_v37 }
 0x288   : > { %v1231_v47 = vpop.xlane.xlu1 %1230 }
 0x289   : > { %v3421_v49 = vmax.f32 %v3409_v44, %v1231_v47  ;;  %1333 = vperm.xlu1 %2810, %v3387_v34   ;;  %1834 = vst.msk [vmem:[#allocation3 + $0x20] sm:$0xff] %vm656_vm2, %v3416_v46  ;;  %v3496_v47 = vld [vmem:[#allocation3 + $0x70] sm:$0xff]  ;;  %v3811_v32 = vsub.f32 %v3399_v41, %v3416_v46 }
 0x28a   : > { %v1233_v52 = vpop.xlane.xlu0 %1232 }
 0x28b   : > { %1835 = vst.msk [vmem:[#allocation3 + $0x28] sm:$0xff] %vm656_vm2, %v3421_v49  ;;  %v3435_v54 = vmax.f32 %v3418_v48, %v1233_v52  ;;  %v1292_v42 = vmul.f32 1.442695, %v3811_v32  ;;  %v3814_v27 = vsub.f32 %v3409_v44, %v3421_v49 }
 0x28c   : > { %v1235_v55 = vpop.xlane.xlu1 %1234 }
 0x28d   : > { %v3440_v57 = vmax.f32 %v3428_v51, %v1235_v55  ;;  %1328 = vperm.xlu1 %2810, %v3406_v36   ;;  %1836 = vst.msk [vmem:[#allocation3 + $0x30] sm:$0xff] %vm656_vm2, %v3435_v54  ;;  %v3813_v38 = vsub.f32 %v3418_v48, %v3435_v54  ;;  %v1294_v30 = vmul.f32 1.442695, %v3814_v27 }
 0x28e   : > { %v1237_v62 = vpop.xlane.xlu0 %1236 }
 0x28f   : > { %1837 = vst.msk [vmem:[#allocation3 + $0x38] sm:$0xff] %vm656_vm2, %v3440_v57  ;;  %v3454_v2 = vmax.f32 %v3437_v56, %v1237_v62  ;;  %v3506_v62 = vld [vmem:[#allocation3 + $0x78] sm:$0xff]  ;;  %v1296_v36 = vmul.f32 1.442695, %v3813_v38 }
 0x290   : > { %v1239_v5 = vpop.xlane.xlu1 %1238  ;;  %v1451_v38 = vld [vmem:[#allocation4 + $0x38] sm:$0xff] }
 0x291   : > { %v3459_v9 = vmax.f32 %v3447_v60, %v1239_v5  ;;  %1343 = vperm.xlu1 %2810, %v3421_v49   ;;  %1838 = vst.msk [vmem:[#allocation3 + $0x40] sm:$0xff] %vm656_vm2, %v3454_v2 }
 0x292   : > { %v1241_v14 = vpop.xlane.xlu0 %1240 }
 0x293   : > { %1839 = vst.msk [vmem:[#allocation3 + $0x48] sm:$0xff] %vm656_vm2, %v3459_v9  ;;  %1363 = vperm.xlu0 %2809, %v3459_v9   ;;  %v3474_v18 = vmax.f32 %v3456_v6, %v1241_v14  ;;  %v3817_v44 = vsub.f32 %v3447_v60, %v3459_v9 }
 0x294   : > { %v1243_v19 = vpop.xlane.xlu1 %1242 }
 0x295   : > { %v3479_v23 = vmax.f32 %v3466_v11, %v1243_v19  ;;  %1338 = vperm.xlu1 %2810, %v3416_v46   ;;  %1840 = vst.msk [vmem:[#allocation3 + $0x50] sm:$0xff] %vm656_vm2, %v3474_v18  ;;  %v1302_v49 = vmul.f32 1.442695, %v3817_v44 }
 0x296   : > { %v1245_v31 = vpop.xlane.xlu0 %1244 }
 0x297   : > { %1841 = vst.msk [vmem:[#allocation3 + $0x58] sm:$0xff] %vm656_vm2, %v3479_v23  ;;  %1373 = vperm.xlu0 %2809, %v3479_v23   ;;  %v3494_v39 = vmax.f32 %v3476_v22, %v1245_v31  ;;  %v3819_v60 = vsub.f32 %v3466_v11, %v3479_v23 }
 0x298   : > { %v1247_v37 = vpop.xlane.xlu1 %1246 }
 0x299   : > { %v3499_v52 = vmax.f32 %v3486_v28, %v1247_v37  ;;  %1353 = vperm.xlu1 %2810, %v3440_v57   ;;  %1842 = vst.msk [vmem:[#allocation3 + $0x60] sm:$0xff] %vm656_vm2, %v3494_v39  ;;  %v1306_v9 = vmul.f32 1.442695, %v3819_v60  ;;  %v1993_v60 = vld [vmem:[%s3807_s6] sm:$0xff] }
 0x29a   : > { %v1249_v5 = vpop.xlane.xlu0 %1248 }
 0x29b   : > { %1843 = vst.msk [vmem:[#allocation3 + $0x68] sm:$0xff] %vm656_vm2, %v3499_v52  ;;  %1383 = vperm.xlu0 %2809, %v3499_v52   ;;  %v3514_v19 = vmax.f32 %v3496_v47, %v1249_v5 }
 0x29c   : > { %v1251_v31 = vpop.xlane.xlu1 %1250 }
 0x29d   : > { %v3517_v37 = vmax.f32 %v3506_v62, %v1251_v31  ;;  %1348 = vperm.xlu1 %2810, %v3435_v54   ;;  %1844 = vst.msk [vmem:[#allocation3 + $0x70] sm:$0xff] %vm656_vm2, %v3514_v19 }
 0x29f   : > { %1845 = vst.msk [vmem:[#allocation3 + $0x78] sm:$0xff] %vm656_vm2, %v3517_v37  ;;  %1393 = vperm.xlu0 %2809, %v3517_v37  }
 0x2a1   : > { %1358 = vperm.xlu1 %2810, %v3454_v2  }
 0x2a5   : > { %1368 = vperm.xlu1 %2810, %v3474_v18  }
 0x2a9   : > { %1378 = vperm.xlu1 %2810, %v3494_v39  }
 0x2ad   : > { %1388 = vperm.xlu1 %2810, %v3514_v19  }
 0x2fc   : > { %v1319_v5 = vpop.permute.xlu0 %1318 }
 0x2fd   : > { %v1396_v31 = vsub.f32 %v3263_v59, %v1319_v5 }
 0x2ff   : > { %v1412_v55 = vmul.f32 1.442695, %v1396_v31 }
 0x300   : > { %v1324_v35 = vpop.permute.xlu1 %1323 }
 0x301   : > { %2811 = vpow2.f32 %v1412_v55  ;;  %v1397_v14 = vsub.f32 %v3273_v63, %v1324_v35 }
 0x303   : > { %v1414_v24 = vmul.f32 1.442695, %v1397_v14 }
 0x304   : > { %v1334_v15 = vpop.permute.xlu1 %1333 }
 0x305   : > { %2813 = vpow2.f32 %v1414_v24  ;;  %v1399_v10 = vsub.f32 %v3268_v61, %v1334_v15 }
 0x307   : > { %v1418_v1 = vmul.f32 1.442695, %v1399_v10 }
 0x308   : > { %v1329_v53 = vpop.permute.xlu1 %1328 }
 0x309   : > { %2815 = vpow2.f32 %v1418_v1  ;;  %v1398_v58 = vsub.f32 %v3277_v0, %v1329_v53 }
 0x30b   : > { %v1416_v40 = vmul.f32 1.442695, %v1398_v58 }
 0x30c   : > { %v1344_v50 = vpop.permute.xlu1 %1343 }
 0x30d   : > { %2817 = vpow2.f32 %v1416_v40  ;;  %v1401_v59 = vsub.f32 %v3283_v3, %v1344_v50 }
 0x30e   : > { %v2812_v5 = vpop.eup %2811  ;;  %v1364_v31 = vpop.permute.xlu0 %1363 }
 0x30f   : > { %v1422_v55 = vmul.f32 1.442695, %v1401_v59  ;;  %1476 = vadd.xlane.f32.xlu1 %v2812_v5  ;;  %2730 = vmatprep.mubr.f32.mxu1 %v2812_v5  ;;  %v1405_v3 = vsub.f32 %v3303_v12, %v1364_v31 }
 0x310   : > { %v1339_v63 = vpop.permute.xlu1 %1338 }
 0x311   : > { %2819 = vpow2.f32 %v1422_v55  ;;  %v1400_v24 = vsub.f32 %v3287_v4, %v1339_v63  ;;  %v1430_v14 = vmul.f32 1.442695, %v1405_v3 }
 0x312   : > { %v2814_v61 = vpop.eup %2813  ;;  %v1374_v15 = vpop.permute.xlu0 %1373 }
 0x313   : > { %v1420_v10 = vmul.f32 1.442695, %v1400_v24  ;;  %1478 = vadd.xlane.f32.xlu0 %v2814_v61  ;;  %2731 = vmatmul.mubr.f32.vlgmr.msra.gmra.mxu1 %v2814_v61  ;;  %v1407_v59 = vsub.f32 %v3313_v16, %v1374_v15 }
 0x314   : > { %v1354_v0 = vpop.permute.xlu1 %1353 }
 0x315   : > { %2821 = vpow2.f32 %v1420_v10  ;;  %v1403_v40 = vsub.f32 %v3293_v7, %v1354_v0  ;;  %v1434_v31 = vmul.f32 1.442695, %v1407_v59 }
 0x316   : > { %v2816_v53 = vpop.eup %2815  ;;  %v1384_v1 = vpop.permute.xlu0 %1383 }
 0x317   : > { %v1426_v50 = vmul.f32 1.442695, %v1403_v40  ;;  %1482 = vadd.xlane.f32.xlu1 %v2816_v53  ;;  %v1409_v63 = vsub.f32 %v3323_v20, %v1384_v1 }
 0x318   : > { %v1349_v58 = vpop.permute.xlu1 %1348 }
 0x319   : > { %2823 = vpow2.f32 %v1426_v50  ;;  %v1402_v35 = vsub.f32 %v3297_v8, %v1349_v58  ;;  %v1438_v15 = vmul.f32 1.442695, %v1409_v63 }
 0x31a   : > { %v2818_v4 = vpop.eup %2817  ;;  %v1394_v24 = vpop.permute.xlu0 %1393 }
 0x31b   : > { %v1424_v5 = vmul.f32 1.442695, %v1402_v35  ;;  %1480 = vadd.xlane.f32.xlu0 %v2818_v4  ;;  %2733 = vmatprep.mubr.f32.mxu1 %v2818_v4  ;;  %v1411_v0 = vsub.f32 %v3365_v25, %v1394_v24 }
 0x31c   : > { %v1359_v55 = vpop.permute.xlu1 %1358  ;;  %2734 = vmatmul.mubr.f32.gmra.mxu1 %v2816_v53 }
 0x31d   : > { %2825 = vpow2.f32 %v1424_v5  ;;  %v1404_v7 = vsub.f32 %v3307_v13, %v1359_v55  ;;  %v1442_v3 = vmul.f32 1.442695, %v1411_v0  ;;  %v1286_v55 = vmul.f32 1.442695, %v1269_v43 }
 0x31e   : > { %v2820_v12 = vpop.eup %2819  ;;  %2827 = vpow2.f32 %v1430_v14  ;;  %v3812_v43 = vsub.f32 %v3375_v29, %v3387_v34  ;;  %v3816_v29 = vsub.f32 %v3437_v56, %v3454_v2  ;;  %v3818_v56 = vsub.f32 %v3456_v6, %v3474_v18 }
 0x31f   : > { %v1428_v61 = vmul.f32 1.442695, %v1404_v7  ;;  %1486 = vadd.xlane.f32.xlu1 %v2820_v12  ;;  %v3820_v6 = vsub.f32 %v3476_v22, %v3494_v39  ;;  %v3823_v39 = vsub.f32 %v3506_v62, %v3517_v37  ;;  %v1994_v37 = vld [vmem:[%s3807_s6 + $0x8] sm:$0xff] }
 0x320   : > { %v1369_v8 = vpop.permute.xlu1 %1368  ;;  %v1290_v63 = vmul.f32 1.442695, %v3812_v43  ;;  %v1300_v34 = vmul.f32 1.442695, %v3816_v29  ;;  %2754 = vmatprep.subr.mxu1 %v1994_v37 }
 0x321   : > { %2829 = vpow2.f32 %v1428_v61  ;;  %v1406_v16 = vsub.f32 %v3317_v17, %v1369_v8  ;;  %v1308_v18 = vmul.f32 1.442695, %v3820_v6  ;;  %v1314_v0 = vmul.f32 1.442695, %v3823_v39  ;;  %2755 = vmatpush3.msra.mxu1 %v1994_v37 }
 0x322   : > { %v2822_v10 = vpop.eup %2821  ;;  %2831 = vpow2.f32 %v1434_v31  ;;  %v1284_v31 = vmul.f32 1.442695, %v1268_v33  ;;  %v3815_v33 = vsub.f32 %v3428_v51, %v3440_v57  ;;  %v1304_v57 = vmul.f32 1.442695, %v3818_v56  ;;  %2756 = vmatprep.subr.mxu1 %v1993_v60 }
 0x323   : > { %v1432_v40 = vmul.f32 1.442695, %v1406_v16  ;;  %1484 = vadd.xlane.f32.xlu0 %v2822_v10  ;;  %2736 = vmatprep.mubr.f32.mxu1 %v2822_v10  ;;  %v3821_v16 = vsub.f32 %v3486_v28, %v3499_v52  ;;  %v3822_v10 = vsub.f32 %v3496_v47, %v3514_v19 }
 0x324   : > { %v1379_v13 = vpop.permute.xlu1 %1378  ;;  %2737 = vmatmul.mubr.f32.gmra.mxu1 %v2820_v12  ;;  %v1288_v12 = vmul.f32 1.442695, %v1270_v45  ;;  %v1298_v41 = vmul.f32 1.442695, %v3815_v33 }
 0x325   : > { %2833 = vpow2.f32 %v1432_v40  ;;  %v1408_v20 = vsub.f32 %v3327_v21, %v1379_v13  ;;  %v1310_v11 = vmul.f32 1.442695, %v3821_v16  ;;  %v1444_v40 = vld [vmem:[#allocation4] sm:$0xff]  ;;  %2757 = vmatpush3.msra.mxu1 %v1993_v60  ;;  %v1454_v16 = vld [vmem:[#allocation4 + $0x50] sm:$0xff]  ;;  %v1544_v60 = vld [vmem:[#allocation5 + $0x18] sm:$0xff] }
 0x326   : > { %v2824_v53 = vpop.eup %2823  ;;  %2835 = vpow2.f32 %v1438_v15  ;;  %v1312_v15 = vmul.f32 1.442695, %v3822_v10 }
 0x327   : > { %v1436_v50 = vmul.f32 1.442695, %v1408_v20  ;;  %1490 = vadd.xlane.f32.xlu1 %v2824_v53 }
 0x328   : > { %v1389_v58 = vpop.permute.xlu1 %1388 }
 0x329   : > { %2837 = vpow2.f32 %v1436_v50  ;;  %v1410_v17 = vsub.f32 %v3369_v26, %v1389_v58 }
 0x32a   : > { %v2826_v1 = vpop.eup %2825  ;;  %2839 = vpow2.f32 %v1442_v3 }
 0x32b   : > { %v2828_v25 = vpop.eup %2827  ;;  %v1440_v35 = vmul.f32 1.442695, %v1410_v17  ;;  %1488 = vadd.xlane.f32.xlu0 %v2826_v1  ;;  %2739 = vmatprep.mubr.f32.mxu1 %v2826_v1  ;;  %v1447_v17 = vld [vmem:[#allocation4 + $0x18] sm:$0xff] }
 0x32c   : > { %1494 = vadd.xlane.f32.xlu1 %v2828_v25  ;;  %2740 = vmatmul.mubr.f32.gmra.mxu1 %v2824_v53  ;;  %v1445_v53 = vld [vmem:[#allocation4 + $0x8] sm:$0xff] }
 0x32d   : > { %2841 = vpow2.f32 %v1440_v35 }
 0x32e   : > { %v2830_v4 = vpop.eup %2829  ;;  %2843 = vpow2.f32 %v1286_v55 }
 0x32f   : > { %v2832_v21 = vpop.eup %2831  ;;  %1492 = vadd.xlane.f32.xlu0 %v2830_v4  ;;  %2742 = vmatprep.mubr.f32.mxu1 %v2830_v4  ;;  %2845 = vpow2.f32 %v1288_v12  ;;  %v1446_v4 = vld [vmem:[#allocation4 + $0x10] sm:$0xff] }
 0x330   : > { %1498 = vadd.xlane.f32.xlu1 %v2832_v21  ;;  %2743 = vmatmul.mubr.f32.gmra.mxu1 %v2828_v25  ;;  %2847 = vpow2.f32 %v1284_v31  ;;  %v1448_v31 = vld [vmem:[#allocation4 + $0x20] sm:$0xff] }
 0x331   : > { %2849 = vpow2.f32 %v1292_v42 }
 0x332   : > { %v2834_v14 = vpop.eup %2833  ;;  %2851 = vpow2.f32 %v1290_v63 }
 0x333   : > { %v2836_v59 = vpop.eup %2835  ;;  %1496 = vadd.xlane.f32.xlu0 %v2834_v14  ;;  %2745 = vmatprep.mubr.f32.mxu1 %v2834_v14  ;;  %2853 = vpow2.f32 %v1296_v36 }
 0x334   : > { %1502 = vadd.xlane.f32.xlu1 %v2836_v59  ;;  %2746 = vmatmul.mubr.f32.gmra.mxu1 %v2832_v21  ;;  %2855 = vpow2.f32 %v1294_v30 }
 0x335   : > { %2857 = vpow2.f32 %v1298_v41  ;;  %v1450_v41 = vld [vmem:[#allocation4 + $0x30] sm:$0xff] }
 0x336   : > { %v2838_v26 = vpop.eup %2837  ;;  %2859 = vpow2.f32 %v1300_v34  ;;  %v1453_v34 = vld [vmem:[#allocation4 + $0x48] sm:$0xff] }
 0x337   : > { %v2840_v5 = vpop.eup %2839  ;;  %1500 = vadd.xlane.f32.xlu0 %v2838_v26  ;;  %2748 = vmatprep.mubr.f32.mxu1 %v2838_v26  ;;  %2861 = vpow2.f32 %v1302_v49  ;;  %v1449_v26 = vld [vmem:[#allocation4 + $0x28] sm:$0xff] }
 0x338   : > { %1506 = vadd.xlane.f32.xlu1 %v2840_v5  ;;  %2749 = vmatmul.mubr.f32.gmra.mxu1 %v2836_v59  ;;  %2863 = vpow2.f32 %v1304_v57 }
 0x339   : > { %2865 = vpow2.f32 %v1306_v9 }
 0x33a   : > { %v2842_v7 = vpop.eup %2841  ;;  %2867 = vpow2.f32 %v1308_v18 }
 0x33b   : > { %1504 = vadd.xlane.f32.xlu0 %v2842_v7  ;;  %2751 = vmatprep.mubr.f32.mxu1 %v2842_v7  ;;  %v2844_v45 = vpop.eup %2843  ;;  %2869 = vpow2.f32 %v1310_v11 }
 0x33c   : > { %2752 = vmatmul.mubr.f32.gmra.mxu1 %v2840_v5  ;;  %v3576_v46 = vpop.eup %2845  ;;  %2871 = vpow2.f32 %v1312_v15  ;;  %v1461_v50 = vmul.f32 %v2844_v45, %v1445_v53  ;;  %v1457_v15 = vld [vmem:[#allocation4 + $0x68] sm:$0xff] }
 0x33d   : > { %v2848_v48 = vpop.eup %2847  ;;  %2873 = vpow2.f32 %v1314_v0  ;;  %v1462_v14 = vmul.f32 %v3576_v46, %v1446_v4 }
 0x33e   : > { %v3582_v51 = vpop.eup %2849  ;;  %v1460_v13 = vmul.f32 %v2848_v48, %v1444_v40 }
 0x33f   : > { %v2852_v54 = vpop.eup %2851  ;;  %v1464_v43 = vmul.f32 %v3582_v51, %v1448_v31 }
 0x340   : > { %v3588_v2 = vpop.eup %2853  ;;  %v1463_v25 = vmul.f32 %v2852_v54, %v1447_v17 }
 0x341   : > { %v2856_v24 = vpop.eup %2855 }
 0x342   : > { %v3594_v61 = vpop.eup %2857  ;;  %v1465_v7 = vmul.f32 %v2856_v24, %v1449_v26 }
 0x343   : > { %v3600_v8 = vpop.eup %2859  ;;  %v1467_v30 = vmul.f32 %v3594_v61, %v1451_v38  ;;  %v1542_v38 = vld [vmem:[#allocation5 + $0x8] sm:$0xff] }
 0x344   : > { %v3606_v23 = vpop.eup %2861 }
 0x345   : > { %v3612_v22 = vpop.eup %2863  ;;  %v1469_v44 = vmul.f32 %v3606_v23, %v1453_v34 }
 0x346   : > { %v3618_v28 = vpop.eup %2865  ;;  %v1470_v0 = vmul.f32 %v3612_v22, %v1454_v16 }
 0x347   : > { %v3621_v52 = vpop.eup %2867 }
 0x348   : > { %v3624_v47 = vpop.eup %2869 }
 0x349   : > { %1564 = vperm.xlu1 %2810, %v2844_v45   ;;  %v3627_v19 = vpop.eup %2871  ;;  %v1473_v37 = vmul.f32 %v3624_v47, %v1457_v15 }
 0x34a   : > { %v3630_v62 = vpop.eup %2873 }
 0x34d   : > { %1569 = vperm.xlu1 %2810, %v3576_v46   ;;  %v1466_v46 = vmul.f32 %v3588_v2, %v1450_v41 }
 0x351   : > { %1579 = vperm.xlu1 %2810, %v3582_v51   ;;  %1559 = vperm.xlu0 %2809, %v2848_v48   ;;  %v1452_v51 = vld [vmem:[#allocation4 + $0x40] sm:$0xff] }
 0x355   : > { %1589 = vperm.xlu1 %2810, %v3588_v2   ;;  %1574 = vperm.xlu0 %2809, %v2852_v54   ;;  %v1468_v2 = vmul.f32 %v3600_v8, %v1452_v51 }
 0x359   : > { %1594 = vperm.xlu1 %2810, %v3594_v61   ;;  %1584 = vperm.xlu0 %2809, %v2856_v24   ;;  %v1455_v24 = vld [vmem:[#allocation4 + $0x58] sm:$0xff] }
 0x35a   : > { %v1471_v6 = vmul.f32 %v3618_v28, %v1455_v24 }
 0x35d   : > { %1599 = vperm.xlu1 %2810, %v3600_v8  }
 0x361   : > { %1604 = vperm.xlu1 %2810, %v3606_v23  }
 0x365   : > { %1609 = vperm.xlu1 %2810, %v3612_v22  }
 0x369   : > { %1614 = vperm.xlu1 %2810, %v3618_v28   ;;  %v1456_v28 = vld [vmem:[#allocation4 + $0x60] sm:$0xff] }
 0x36d   : > { %1619 = vperm.xlu1 %2810, %v3621_v52  }
 0x371   : > { %1624 = vperm.xlu1 %2810, %v3624_v47   ;;  %v1458_v47 = vld [vmem:[#allocation4 + $0x70] sm:$0xff] }
 0x375   : > { %1629 = vperm.xlu1 %2810, %v3627_v19  }
 0x379   : > { %1634 = vperm.xlu1 %2810, %v3630_v62  }
 0x398   : > { %v1477_v20 = vpop.xlane.xlu1 %1476 }
 0x399   : > { %v1508_v3 = vadd.f32 %v1477_v20, %v1460_v13 }
 0x39b   : > { %1525 = vst.msk [vmem:[#allocation4] sm:$0xff] %vm656_vm2, %v1508_v3  ;;  %v1459_v3 = vld [vmem:[#allocation4 + $0x78] sm:$0xff] }
 0x39c   : > { %v1479_v58 = vpop.xlane.xlu0 %1478  ;;  %v1475_v17 = vmul.f32 %v3630_v62, %v1459_v3 }
 0x39d   : > { %v1509_v1 = vadd.f32 %v1479_v58, %v1461_v50  ;;  %v1472_v58 = vmul.f32 %v3621_v52, %v1456_v28 }
 0x39f   : > { %1526 = vst.msk [vmem:[#allocation4 + $0x8] sm:$0xff] %vm656_vm2, %v1509_v1 }
 0x3a0   : > { %v1483_v35 = vpop.xlane.xlu1 %1482 }
 0x3a1   : > { %v1511_v21 = vadd.f32 %v1483_v35, %v1463_v25 }
 0x3a2   : > { %v1849_v32 = vld [vmem:[#allocation4] sm:$0xff] }
 0x3a3   : > { %1528 = vst.msk [vmem:[#allocation4 + $0x18] sm:$0xff] %vm656_vm2, %v1511_v21 }
 0x3a4   : > { %v1481_v59 = vpop.xlane.xlu0 %1480 }
 0x3a5   : > { %v1510_v5 = vadd.f32 %v1481_v59, %v1462_v14  ;;  %v1474_v14 = vmul.f32 %v3627_v19, %v1458_v47  ;;  %v1548_v47 = vld [vmem:[#allocation5 + $0x38] sm:$0xff] }
 0x3a6   : > { %v1850_v55 = vld [vmem:[#allocation4 + $0x8] sm:$0xff] }
 0x3a7   : > { %1527 = vst.msk [vmem:[#allocation4 + $0x10] sm:$0xff] %vm656_vm2, %v1510_v5  ;;  %2875 = vrcp.f32 %v1850_v55 }
 0x3a8   : > { %v1487_v12 = vpop.xlane.xlu1 %1486  ;;  %2877 = vrcp.f32 %v1849_v32 }
 0x3a9   : > { %v1513_v42 = vadd.f32 %v1487_v12, %v1465_v7 }
 0x3aa   : > { %v1852_v36 = vld [vmem:[#allocation4 + $0x18] sm:$0xff] }
 0x3ab   : > { %1530 = vst.msk [vmem:[#allocation4 + $0x28] sm:$0xff] %vm656_vm2, %v1513_v42  ;;  %2879 = vrcp.f32 %v1852_v36 }
 0x3ac   : > { %v1485_v63 = vpop.xlane.xlu0 %1484 }
 0x3ad   : > { %v1512_v27 = vadd.f32 %v1485_v63, %v1464_v43 }
 0x3ae   : > { %v1851_v45 = vld [vmem:[#allocation4 + $0x10] sm:$0xff] }
 0x3af   : > { %1529 = vst.msk [vmem:[#allocation4 + $0x20] sm:$0xff] %vm656_vm2, %v1512_v27  ;;  %2881 = vrcp.f32 %v1851_v45 }
 0x3b0   : > { %v1491_v33 = vpop.xlane.xlu1 %1490 }
 0x3b1   : > { %v1515_v29 = vadd.f32 %v1491_v33, %v1467_v30  ;;  %v1541_v30 = vld [vmem:[#allocation5] sm:$0xff] }
 0x3b2   : > { %v1854_v54 = vld [vmem:[#allocation4 + $0x28] sm:$0xff] }
 0x3b3   : > { %1532 = vst.msk [vmem:[#allocation4 + $0x38] sm:$0xff] %vm656_vm2, %v1515_v29  ;;  %2883 = vrcp.f32 %v1854_v54 }
 0x3b4   : > { %v2876_v48 = vpop.eup %2875  ;;  %v1489_v49 = vpop.xlane.xlu0 %1488 }
 0x3b5   : > { %v1495_v56 = vpop.xlane.xlu1 %1494  ;;  %v1514_v57 = vadd.f32 %v1489_v49, %v1466_v46  ;;  %1904 = vperm.xlu0 %2809, %v2876_v48   ;;  %v2878_v61 = vpop.eup %2877 }
 0x3b6   : > { %v1517_v9 = vadd.f32 %v1495_v56, %v1469_v44  ;;  %v1853_v11 = vld [vmem:[#allocation4 + $0x20] sm:$0xff] }
 0x3b7   : > { %1531 = vst.msk [vmem:[#allocation4 + $0x30] sm:$0xff] %vm656_vm2, %v1514_v57  ;;  %2885 = vrcp.f32 %v1853_v11 }
 0x3b8   : > { %1534 = vst.msk [vmem:[#allocation4 + $0x48] sm:$0xff] %vm656_vm2, %v1517_v9  ;;  %v1493_v18 = vpop.xlane.xlu0 %1492  ;;  %v2880_v8 = vpop.eup %2879 }
 0x3b9   : > { %v1499_v23 = vpop.xlane.xlu1 %1498  ;;  %v1516_v10 = vadd.f32 %v1493_v18, %v1468_v2  ;;  %1899 = vperm.xlu0 %2809, %v2878_v61   ;;  %v1543_v61 = vld [vmem:[#allocation5 + $0x10] sm:$0xff] }
 0x3ba   : > { %v1519_v39 = vadd.f32 %v1499_v23, %v1471_v6  ;;  %v1856_v13 = vld [vmem:[#allocation4 + $0x38] sm:$0xff] }
 0x3bb   : > { %1533 = vst.msk [vmem:[#allocation4 + $0x40] sm:$0xff] %vm656_vm2, %v1516_v10  ;;  %2887 = vrcp.f32 %v1856_v13  ;;  %v1545_v13 = vld [vmem:[#allocation5 + $0x20] sm:$0xff] }
 0x3bc   : > { %1536 = vst.msk [vmem:[#allocation4 + $0x58] sm:$0xff] %vm656_vm2, %v1519_v39  ;;  %v1497_v40 = vpop.xlane.xlu0 %1496  ;;  %v2882_v22 = vpop.eup %2881 }
 0x3bd   : > { %v1503_v20 = vpop.xlane.xlu1 %1502  ;;  %v1518_v53 = vadd.f32 %v1497_v40, %v1470_v0  ;;  %1914 = vperm.xlu0 %2809, %v2880_v8  }
 0x3be   : > { %v1521_v50 = vadd.f32 %v1503_v20, %v1473_v37  ;;  %v1855_v25 = vld [vmem:[#allocation4 + $0x30] sm:$0xff]  ;;  %v1546_v37 = vld [vmem:[#allocation5 + $0x28] sm:$0xff] }
 0x3bf   : > { %1535 = vst.msk [vmem:[#allocation4 + $0x50] sm:$0xff] %vm656_vm2, %v1518_v53  ;;  %2889 = vrcp.f32 %v1855_v25  ;;  %v1858_v7 = vld [vmem:[#allocation4 + $0x48] sm:$0xff] }
 0x3c0   : > { %1538 = vst.msk [vmem:[#allocation4 + $0x68] sm:$0xff] %vm656_vm2, %v1521_v50  ;;  %v1501_v1 = vpop.xlane.xlu0 %1500  ;;  %v2884_v52 = vpop.eup %2883 }
 0x3c1   : > { %v1507_v35 = vpop.xlane.xlu1 %1506  ;;  %v1520_v4 = vadd.f32 %v1501_v1, %v1472_v58  ;;  %1909 = vperm.xlu0 %2809, %v2882_v22  }
 0x3c2   : > { %v1523_v21 = vadd.f32 %v1507_v35, %v1475_v17  ;;  %v1857_v59 = vld [vmem:[#allocation4 + $0x40] sm:$0xff]  ;;  %v1547_v35 = vld [vmem:[#allocation5 + $0x30] sm:$0xff] }
 0x3c3   : > { %1537 = vst.msk [vmem:[#allocation4 + $0x60] sm:$0xff] %vm656_vm2, %v1520_v4  ;;  %2891 = vrcp.f32 %v1857_v59  ;;  %v1860_v32 = vld [vmem:[#allocation4 + $0x58] sm:$0xff] }
 0x3c4   : > { %1540 = vst.msk [vmem:[#allocation4 + $0x78] sm:$0xff] %vm656_vm2, %v1523_v21  ;;  %v1505_v26 = vpop.xlane.xlu0 %1504  ;;  %v2886_v12 = vpop.eup %2885  ;;  %v1550_v21 = vld [vmem:[#allocation5 + $0x48] sm:$0xff] }
 0x3c5   : > { %v1565_v5 = vpop.permute.xlu1 %1564  ;;  %v1522_v55 = vadd.f32 %v1505_v26, %v1474_v14  ;;  %1924 = vperm.xlu0 %2809, %v2884_v52  }
 0x3c6   : > { %v1859_v62 = vld [vmem:[#allocation4 + $0x50] sm:$0xff]  ;;  %v1638_v45 = vmul.f32 %v1565_v5, %v1542_v38  ;;  %v1549_v5 = vld [vmem:[#allocation5 + $0x40] sm:$0xff] }
 0x3c7   : > { %1539 = vst.msk [vmem:[#allocation4 + $0x70] sm:$0xff] %vm656_vm2, %v1522_v55  ;;  %2893 = vrcp.f32 %v1859_v62  ;;  %v1862_v27 = vld [vmem:[#allocation4 + $0x68] sm:$0xff] }
 0x3c8   : > { %2895 = vrcp.f32 %v1858_v7  ;;  %v2888_v42 = vpop.eup %2887 }
 0x3c9   : > { %v1570_v31 = vpop.permute.xlu1 %1569  ;;  %1919 = vperm.xlu0 %2809, %v2886_v12   ;;  %v1552_v12 = vld [vmem:[#allocation5 + $0x58] sm:$0xff] }
 0x3ca   : > { %v1861_v19 = vld [vmem:[#allocation4 + $0x60] sm:$0xff]  ;;  %v1639_v23 = vmul.f32 %v1570_v31, %v1543_v61 }
 0x3cb   : > { %2897 = vrcp.f32 %v1861_v19  ;;  %v1864_v49 = vld [vmem:[#allocation4 + $0x78] sm:$0xff] }
 0x3cc   : > { %2899 = vrcp.f32 %v1860_v32  ;;  %v2890_v36 = vpop.eup %2889  ;;  %v1560_v33 = vpop.permute.xlu0 %1559 }
 0x3cd   : > { %v1580_v43 = vpop.permute.xlu1 %1579  ;;  %1934 = vperm.xlu0 %2809, %v2888_v42   ;;  %v1637_v48 = vmul.f32 %v1560_v33, %v1541_v30  ;;  %v1551_v42 = vld [vmem:[#allocation5 + $0x50] sm:$0xff] }
 0x3ce   : > { %v1863_v63 = vld [vmem:[#allocation4 + $0x70] sm:$0xff]  ;;  %v1641_v50 = vmul.f32 %v1580_v43, %v1545_v13 }
 0x3cf   : > { %2901 = vrcp.f32 %v1863_v63 }
 0x3d0   : > { %v2892_v29 = vpop.eup %2891  ;;  %2903 = vrcp.f32 %v1862_v27  ;;  %v1575_v9 = vpop.permute.xlu0 %1574  ;;  %v1554_v27 = vld [vmem:[#allocation5 + $0x68] sm:$0xff] }
 0x3d1   : > { %v1590_v41 = vpop.permute.xlu1 %1589  ;;  %1929 = vperm.xlu0 %2809, %v2890_v36   ;;  %2905 = vrcp.f32 %v1864_v49  ;;  %v1640_v18 = vmul.f32 %v1575_v9, %v1544_v60 }
 0x3d2   : > { %v1643_v59 = vmul.f32 %v1590_v41, %v1547_v35 }
 0x3d3   : > { %v2732_v34 = vpop.f32.mrf.mxu1 }
 0x3d4   : > { %v2894_v46 = vpop.eup %2893  ;;  %v1799_v44 = vadd.f32 %v2732_v34, %v1638_v45  ;;  %v1585_v40 = vpop.permute.xlu0 %1584  ;;  %v1553_v45 = vld [vmem:[#allocation5 + $0x60] sm:$0xff] }
 0x3d5   : > { %v1595_v51 = vpop.permute.xlu1 %1594  ;;  %v1719_v54 = vpop.f32.mrf.mxu1  ;;  %1939 = vperm.xlu0 %2809, %v2892_v29   ;;  %1949 = vperm.xlu1 %2810, %v2894_v46   ;;  %v1642_v20 = vmul.f32 %v1585_v40, %v1546_v37 }
 0x3d6   : > { %1815 = vst.msk [vmem:[#allocation5 + $0x8] sm:$0xff] %vm445_vm0, %v1799_v44  ;;  %v1798_v56 = vadd.f32 %v1719_v54, %v1637_v48  ;;  %v2896_v57 = vpop.eup %2895  ;;  %v1644_v4 = vmul.f32 %v1595_v51, %v1548_v47  ;;  %v1556_v48 = vld [vmem:[#allocation5 + $0x78] sm:$0xff] }
 0x3d8   : > { %v2898_v24 = vpop.eup %2897  ;;  %1814 = vst.msk [vmem:[#allocation5] sm:$0xff] %vm445_vm0, %v1798_v56  ;;  %v1555_v56 = vld [vmem:[#allocation5 + $0x70] sm:$0xff] }
 0x3d9   : > { %v1600_v2 = vpop.permute.xlu1 %1599  ;;  %1944 = vperm.xlu0 %2809, %v2896_v57   ;;  %1959 = vperm.xlu1 %2810, %v2898_v24   ;;  %v2900_v6 = vpop.eup %2899 }
 0x3da   : > { %v1645_v19 = vmul.f32 %v1600_v2, %v1549_v5 }
 0x3dc   : > { %v2902_v16 = vpop.eup %2901  ;;  %v2735_v11 = vpop.f32.mrf.mxu1 }
 0x3dd   : > { %v1801_v10 = vadd.f32 %v2735_v11, %v1640_v18  ;;  %v1605_v15 = vpop.permute.xlu1 %1604  ;;  %1954 = vperm.xlu0 %2809, %v2900_v6   ;;  %1969 = vperm.xlu1 %2810, %v2902_v16   ;;  %v2904_v8 = vpop.eup %2903 }
 0x3de   : > { %v1729_v39 = vpop.f32.mrf.mxu1  ;;  %v2906_v53 = vpop.eup %2905  ;;  %v1646_v62 = vmul.f32 %v1605_v15, %v1550_v21 }
 0x3df   : > { %1817 = vst.msk [vmem:[#allocation5 + $0x18] sm:$0xff] %vm445_vm0, %v1801_v10  ;;  %v1800_v0 = vadd.f32 %v1729_v39, %v1639_v23  ;;  %v1881_v11 = vld [vmem:[#allocation5] sm:$0xff]  ;;  %v1882_v10 = vld [vmem:[#allocation5 + $0x8] sm:$0xff] }
 0x3e1   : > { %1816 = vst.msk [vmem:[#allocation5 + $0x10] sm:$0xff] %vm445_vm0, %v1800_v0  ;;  %v1610_v28 = vpop.permute.xlu1 %1609  ;;  %1964 = vperm.xlu0 %2809, %v2904_v8  }
 0x3e2   : > { %v1647_v33 = vmul.f32 %v1610_v28, %v1551_v42 }
 0x3e4   : > { %v2738_v3 = vpop.f32.mrf.mxu1 }
 0x3e5   : > { %v1803_v58 = vadd.f32 %v2738_v3, %v1642_v20  ;;  %v1615_v22 = vpop.permute.xlu1 %1614  ;;  %1974 = vperm.xlu0 %2809, %v2906_v53  }
 0x3e6   : > { %v1739_v17 = vpop.f32.mrf.mxu1  ;;  %v1648_v38 = vmul.f32 %v1615_v22, %v1552_v12  ;;  %v1884_v40 = vld [vmem:[#allocation5 + $0x18] sm:$0xff] }
 0x3e7   : > { %1819 = vst.msk [vmem:[#allocation5 + $0x28] sm:$0xff] %vm445_vm0, %v1803_v58  ;;  %v1802_v1 = vadd.f32 %v1739_v17, %v1641_v50 }
 0x3e8   : > { %v1883_v8 = vld [vmem:[#allocation5 + $0x10] sm:$0xff] }
 0x3e9   : > { %1818 = vst.msk [vmem:[#allocation5 + $0x20] sm:$0xff] %vm445_vm0, %v1802_v1  ;;  %v1620_v25 = vpop.permute.xlu1 %1619 }
 0x3ea   : > { %v1649_v51 = vmul.f32 %v1620_v25, %v1553_v45 }
 0x3ec   : > { %v2741_v14 = vpop.f32.mrf.mxu1 }
 0x3ed   : > { %v1805_v52 = vadd.f32 %v2741_v14, %v1644_v4  ;;  %v1625_v26 = vpop.permute.xlu1 %1624 }
 0x3ee   : > { %v1749_v55 = vpop.f32.mrf.mxu1  ;;  %v1650_v34 = vmul.f32 %v1625_v26, %v1554_v27  ;;  %v1886_v50 = vld [vmem:[#allocation5 + $0x28] sm:$0xff] }
 0x3ef   : > { %1821 = vst.msk [vmem:[#allocation5 + $0x38] sm:$0xff] %vm445_vm0, %v1805_v52  ;;  %v1804_v7 = vadd.f32 %v1749_v55, %v1643_v59 }
 0x3f0   : > { %v2744_v31 = vpop.f32.mrf.mxu1  ;;  %v1885_v53 = vld [vmem:[#allocation5 + $0x20] sm:$0xff] }
 0x3f1   : > { %1820 = vst.msk [vmem:[#allocation5 + $0x30] sm:$0xff] %vm445_vm0, %v1804_v7  ;;  %v1807_v32 = vadd.f32 %v2744_v31, %v1646_v62  ;;  %v1630_v43 = vpop.permute.xlu1 %1629 }
 0x3f2   : > { %v1759_v63 = vpop.f32.mrf.mxu1  ;;  %v1651_v2 = vmul.f32 %v1630_v43, %v1555_v56 }
 0x3f3   : > { %1823 = vst.msk [vmem:[#allocation5 + $0x48] sm:$0xff] %vm445_vm0, %v1807_v32  ;;  %v1806_v36 = vadd.f32 %v1759_v63, %v1645_v19 }
 0x3f4   : > { %v2747_v30 = vpop.f32.mrf.mxu1 }
 0x3f5   : > { %1822 = vst.msk [vmem:[#allocation5 + $0x40] sm:$0xff] %vm445_vm0, %v1806_v36  ;;  %v1809_v41 = vadd.f32 %v2747_v30, %v1648_v38  ;;  %v1635_v44 = vpop.permute.xlu1 %1634 }
 0x3f6   : > { %v1769_v29 = vpop.f32.mrf.mxu1  ;;  %v1652_v24 = vmul.f32 %v1635_v44, %v1556_v48  ;;  %v1888_v25 = vld [vmem:[#allocation5 + $0x38] sm:$0xff]  ;;  %v3704_v48 = vstv %s2195_s18 }
 0x3f7   : > { %1825 = vst.msk [vmem:[#allocation5 + $0x58] sm:$0xff] %vm445_vm0, %v1809_v41  ;;  %v1808_v46 = vadd.f32 %v1769_v29, %v1647_v33 }
 0x3f8   : > { %v2750_v49 = vpop.f32.mrf.mxu1  ;;  %v1887_v1 = vld [vmem:[#allocation5 + $0x30] sm:$0xff] }
 0x3f9   : > { %1824 = vst.msk [vmem:[#allocation5 + $0x50] sm:$0xff] %vm445_vm0, %v1808_v46  ;;  %v1811_v54 = vadd.f32 %v2750_v49, %v1650_v34  ;;  %v3702_v34 = vld [vmem:[%s3808_s7] ss:$0 sm:$0xff]  ;;  %v2214_v49 = vld [vmem:[%s3040_s28 + $0x8] sm:$0xff] }
 0x3fa   : > { %v1779_v57 = vpop.f32.mrf.mxu1  ;;  %v1890_v26 = vld [vmem:[#allocation5 + $0x48] sm:$0xff] }
 0x3fb   : > { %1827 = vst.msk [vmem:[#allocation5 + $0x68] sm:$0xff] %vm445_vm0, %v1811_v54  ;;  %v1810_v60 = vadd.f32 %v1779_v57, %v1649_v51  ;;  %v2213_v57 = vld [vmem:[%s3040_s28] sm:$0xff] }
 0x3fc   : > { %v2753_v9 = vpop.f32.mrf.mxu1  ;;  %v1889_v14 = vld [vmem:[#allocation5 + $0x40] sm:$0xff] }
 0x3fd   : > { %1826 = vst.msk [vmem:[#allocation5 + $0x60] sm:$0xff] %vm445_vm0, %v1810_v60  ;;  %v1813_v61 = vadd.f32 %v2753_v9, %v1652_v24 }
 0x3fe   : > { %v1789_v6 = vpop.f32.mrf.mxu1  ;;  %v1892_v31 = vld [vmem:[#allocation5 + $0x58] sm:$0xff] }
 0x3ff   : > { %1829 = vst.msk [vmem:[#allocation5 + $0x78] sm:$0xff] %vm445_vm0, %v1813_v61  ;;  %v1812_v18 = vadd.f32 %v1789_v6, %v1651_v2  ;;  %v2216_v6 = vld [vmem:[%s3040_s28 + $0x18] sm:$0xff] }
 0x400   : > { %v1891_v55 = vld [vmem:[#allocation5 + $0x50] sm:$0xff] }
 0x401   : > { %1828 = vst.msk [vmem:[#allocation5 + $0x70] sm:$0xff] %vm445_vm0, %v1812_v18 }
 0x402   : > { %v1894_v38 = vld [vmem:[#allocation5 + $0x68] sm:$0xff] }
 0x404   : > { %v1893_v32 = vld [vmem:[#allocation5 + $0x60] sm:$0xff] }
 0x406   : > { %v1896_v41 = vld [vmem:[#allocation5 + $0x78] sm:$0xff] }
 0x408   : > { %v1895_v27 = vld [vmem:[#allocation5 + $0x70] sm:$0xff] }
 0x430   : > { %v1905_v16 = vpop.permute.xlu0 %1904 }
 0x431   : > { %v1978_v39 = vmul.f32 %v1905_v16, %v1882_v10 }
 0x434   : > { %v1900_v23 = vpop.permute.xlu0 %1899 }
 0x435   : > { %v1977_v15 = vmul.f32 %v1900_v23, %v1881_v11  ;;  %v2215_v23 = vld [vmem:[%s3040_s28 + $0x10] sm:$0xff] }
 0x437   : > { %2758 = vmatprep.mubr.msk.f32.mxu1 %vm445_vm0, %v1977_v15 }
 0x438   : > { %2759 = vmatmul.mubr.msk.f32.vlgmr.msra.gmra.mxu1 %vm445_vm0, %v1978_v39  ;;  %v1915_v0 = vpop.permute.xlu0 %1914 }
 0x439   : > { %v1980_v13 = vmul.f32 %v1915_v0, %v1884_v40 }
 0x43c   : > { %v1910_v37 = vpop.permute.xlu0 %1909 }
 0x43d   : > { %v1979_v28 = vmul.f32 %v1910_v37, %v1883_v8  ;;  %v2218_v37 = vld [vmem:[%s3040_s28 + $0x28] sm:$0xff] }
 0x43f   : > { %2761 = vmatprep.mubr.msk.f32.mxu1 %vm445_vm0, %v1979_v28 }
 0x440   : > { %2762 = vmatmul.mubr.msk.f32.gmra.mxu1 %vm445_vm0, %v1980_v13  ;;  %v1925_v20 = vpop.permute.xlu0 %1924 }
 0x441   : > { %v1982_v22 = vmul.f32 %v1925_v20, %v1886_v50  ;;  %v2217_v20 = vld [vmem:[%s3040_s28 + $0x20] sm:$0xff] }
 0x444   : > { %v1920_v3 = vpop.permute.xlu0 %1919 }
 0x445   : > { %v1981_v58 = vmul.f32 %v1920_v3, %v1885_v53 }
 0x447   : > { %2764 = vmatprep.mubr.msk.f32.mxu1 %vm445_vm0, %v1981_v58 }
 0x448   : > { %2765 = vmatmul.mubr.msk.f32.gmra.mxu1 %vm445_vm0, %v1982_v22  ;;  %v1935_v17 = vpop.permute.xlu0 %1934 }
 0x449   : > { %v1984_v4 = vmul.f32 %v1935_v17, %v1888_v25  ;;  %v2220_v17 = vld [vmem:[%s3040_s28 + $0x38] sm:$0xff] }
 0x44c   : > { %v1930_v47 = vpop.permute.xlu0 %1929 }
 0x44d   : > { %v1983_v35 = vmul.f32 %v1930_v47, %v1887_v1 }
 0x44f   : > { %2767 = vmatprep.mubr.msk.f32.mxu1 %vm445_vm0, %v1983_v35  ;;  %v2219_v35 = vld [vmem:[%s3040_s28 + $0x30] sm:$0xff] }
 0x450   : > { %v1950_v21 = vpop.permute.xlu1 %1949  ;;  %2768 = vmatmul.mubr.msk.f32.gmra.mxu1 %vm445_vm0, %v1984_v4  ;;  %v1940_v59 = vpop.permute.xlu0 %1939 }
 0x451   : > { %v1985_v52 = vmul.f32 %v1940_v59, %v1889_v14  ;;  %v1987_v12 = vmul.f32 %v1950_v21, %v1891_v55 }
 0x453   : > { %2770 = vmatprep.mubr.msk.f32.mxu1 %vm445_vm0, %v1985_v52 }
 0x454   : > { %v1945_v5 = vpop.permute.xlu0 %1944  ;;  %v1960_v62 = vpop.permute.xlu1 %1959 }
 0x455   : > { %v1986_v7 = vmul.f32 %v1945_v5, %v1890_v26  ;;  %v1989_v43 = vmul.f32 %v1960_v62, %v1893_v32  ;;  %v2222_v26 = vld [vmem:[%s3040_s28 + $0x48] sm:$0xff] }
 0x457   : > { %2771 = vmatmul.mubr.msk.f32.gmra.mxu1 %vm445_vm0, %v1986_v7  ;;  %v2221_v7 = vld [vmem:[%s3040_s28 + $0x40] sm:$0xff] }
 0x458   : > { %2773 = vmatprep.mubr.msk.f32.mxu1 %vm445_vm0, %v1987_v12  ;;  %v1955_v19 = vpop.permute.xlu0 %1954  ;;  %v1970_v63 = vpop.permute.xlu1 %1969 }
 0x459   : > { %v1988_v42 = vmul.f32 %v1955_v19, %v1892_v31  ;;  %v1991_v33 = vmul.f32 %v1970_v63, %v1895_v27  ;;  %v2223_v27 = vld [vmem:[%s3040_s28 + $0x50] sm:$0xff] }
 0x45b   : > { %2774 = vmatmul.mubr.msk.f32.gmra.mxu1 %vm445_vm0, %v1988_v42  ;;  %v2224_v42 = vld [vmem:[%s3040_s28 + $0x58] sm:$0xff] }
 0x45c   : > { %2776 = vmatprep.mubr.msk.f32.mxu1 %vm445_vm0, %v1989_v43  ;;  %v1965_v36 = vpop.permute.xlu0 %1964 }
 0x45d   : > { %v1990_v30 = vmul.f32 %v1965_v36, %v1894_v38 }
 0x45f   : > { %2777 = vmatmul.mubr.msk.f32.gmra.mxu1 %vm445_vm0, %v1990_v30 }
 0x460   : > { %2779 = vmatprep.mubr.msk.f32.mxu1 %vm445_vm0, %v1991_v33  ;;  %v1975_v45 = vpop.permute.xlu0 %1974 }
 0x461   : > { %v1992_v29 = vmul.f32 %v1975_v45, %v1896_v41 }
 0x463   : > { %2780 = vmatmul.mubr.msk.f32.gmra.mxu1 %vm445_vm0, %v1992_v29  ;;  %v2226_v29 = vld [vmem:[%s3040_s28 + $0x68] sm:$0xff] }
 0x4f8   : > { %v2760_v46 = vpop.f32.mrf.mxu1 }
 0x4f9   : > { %v2122_v44 = vadd.f32 %v2760_v46, %v3702_v34 }
 0x4fa   : > { %v2116_v51 = vpop.f32.mrf.mxu1 }
 0x4fb   : > { %v2198_v54 = vmul.f32 %v3704_v48, %v2122_v44  ;;  %v2117_v56 = vadd.f32 %v3702_v34, %v2116_v51 }
 0x4fd   : > { %v2230_v24 = vadd.f32 %v2214_v49, %v2198_v54  ;;  %v2197_v60 = vmul.f32 %v3704_v48, %v2117_v56  ;;  %v2225_v54 = vld [vmem:[%s3040_s28 + $0x60] sm:$0xff] }
 0x4ff   : > { %2246 = vst.msk [vmem:[%s3714_s24 + $0x8] sm:$0xff] %vm445_vm0, %v2230_v24  ;;  %v2229_v9 = vadd.f32 %v2213_v57, %v2197_v60 }
 0x500   : > { %v2763_v2 = vpop.f32.mrf.mxu1 }
 0x501   : > { %2245 = vst.msk [vmem:[%s3714_s24] sm:$0xff] %vm445_vm0, %v2229_v9  ;;  %v2132_v61 = vadd.f32 %v2763_v2, %v3702_v34  ;;  %v2228_v9 = vld [vmem:[%s3040_s28 + $0x78] sm:$0xff] }
 0x502   : > { %v2126_v18 = vpop.f32.mrf.mxu1 }
 0x503   : > { %v2200_v16 = vmul.f32 %v3704_v48, %v2132_v61  ;;  %v2127_v11 = vadd.f32 %v3702_v34, %v2126_v18 }
 0x505   : > { %v2232_v10 = vadd.f32 %v2216_v6, %v2200_v16  ;;  %v2199_v15 = vmul.f32 %v3704_v48, %v2127_v11  ;;  %v2227_v16 = vld [vmem:[%s3040_s28 + $0x70] sm:$0xff] }
 0x507   : > { %2248 = vst.msk [vmem:[%s3714_s24 + $0x18] sm:$0xff] %vm445_vm0, %v2232_v10  ;;  %v2231_v39 = vadd.f32 %v2215_v23, %v2199_v15 }
 0x508   : > { %v2766_v0 = vpop.f32.mrf.mxu1 }
 0x509   : > { %2247 = vst.msk [vmem:[%s3714_s24 + $0x10] sm:$0xff] %vm445_vm0, %v2231_v39  ;;  %v2142_v8 = vadd.f32 %v2766_v0, %v3702_v34 }
 0x50a   : > { %v2136_v40 = vpop.f32.mrf.mxu1 }
 0x50b   : > { %v2202_v28 = vmul.f32 %v3704_v48, %v2142_v8  ;;  %v2137_v13 = vadd.f32 %v3702_v34, %v2136_v40 }
 0x50d   : > { %v2234_v53 = vadd.f32 %v2218_v37, %v2202_v28  ;;  %v2201_v3 = vmul.f32 %v3704_v48, %v2137_v13 }
 0x50f   : > { %2250 = vst.msk [vmem:[%s3714_s24 + $0x28] sm:$0xff] %vm445_vm0, %v2234_v53  ;;  %v2233_v50 = vadd.f32 %v2217_v20, %v2201_v3 }
 0x510   : > { %v2769_v58 = vpop.f32.mrf.mxu1 }
 0x511   : > { %2249 = vst.msk [vmem:[%s3714_s24 + $0x20] sm:$0xff] %vm445_vm0, %v2233_v50  ;;  %v2152_v22 = vadd.f32 %v2769_v58, %v3702_v34 }
 0x512   : > { %v2146_v1 = vpop.f32.mrf.mxu1 }
 0x513   : > { %v2204_v47 = vmul.f32 %v3704_v48, %v2152_v22  ;;  %v2147_v25 = vadd.f32 %v3702_v34, %v2146_v1 }
 0x515   : > { %v2236_v4 = vadd.f32 %v2220_v17, %v2204_v47  ;;  %v2203_v21 = vmul.f32 %v3704_v48, %v2147_v25 }
 0x517   : > { %2252 = vst.msk [vmem:[%s3714_s24 + $0x38] sm:$0xff] %vm445_vm0, %v2236_v4  ;;  %v2235_v14 = vadd.f32 %v2219_v35, %v2203_v21  ;;  %v2772_v59 = vpop.f32.mrf.mxu1 }
 0x518   : > { %v2162_v52 = vadd.f32 %v2772_v59, %v3702_v34 }
 0x519   : > { %2251 = vst.msk [vmem:[%s3714_s24 + $0x30] sm:$0xff] %vm445_vm0, %v2235_v14  ;;  %v2156_v5 = vpop.f32.mrf.mxu1 }
 0x51a   : > { %v2206_v55 = vmul.f32 %v3704_v48, %v2162_v52  ;;  %v2157_v62 = vadd.f32 %v3702_v34, %v2156_v5 }
 0x51b   : > { %v2775_v12 = vpop.f32.mrf.mxu1 }
 0x51c   : > { %v2238_v31 = vadd.f32 %v2222_v26, %v2206_v55  ;;  %v2205_v19 = vmul.f32 %v3704_v48, %v2157_v62  ;;  %v2172_v32 = vadd.f32 %v2775_v12, %v3702_v34 }
 0x51d   : > { %v2166_v43 = vpop.f32.mrf.mxu1 }
 0x51e   : > { %2254 = vst.msk [vmem:[%s3714_s24 + $0x48] sm:$0xff] %vm445_vm0, %v2238_v31  ;;  %v2237_v63 = vadd.f32 %v2221_v7, %v2205_v19  ;;  %v2208_v38 = vmul.f32 %v3704_v48, %v2172_v32  ;;  %v2167_v36 = vadd.f32 %v3702_v34, %v2166_v43 }
 0x51f   : > { %v2778_v30 = vpop.f32.mrf.mxu1 }
 0x520   : > { %2253 = vst.msk [vmem:[%s3714_s24 + $0x40] sm:$0xff] %vm445_vm0, %v2237_v63  ;;  %v2240_v33 = vadd.f32 %v2224_v42, %v2208_v38  ;;  %v2207_v41 = vmul.f32 %v3704_v48, %v2167_v36  ;;  %v2182_v45 = vadd.f32 %v2778_v30, %v3702_v34 }
 0x521   : > { %v2176_v46 = vpop.f32.mrf.mxu1 }
 0x522   : > { %2256 = vst.msk [vmem:[%s3714_s24 + $0x58] sm:$0xff] %vm445_vm0, %v2240_v33  ;;  %v2239_v44 = vadd.f32 %v2223_v27, %v2207_v41  ;;  %v2210_v49 = vmul.f32 %v3704_v48, %v2182_v45  ;;  %v2177_v51 = vadd.f32 %v3702_v34, %v2176_v46 }
 0x523   : > { %v2781_v56 = vpop.f32.mrf.mxu1 }
 0x524   : > { %2255 = vst.msk [vmem:[%s3714_s24 + $0x50] sm:$0xff] %vm445_vm0, %v2239_v44  ;;  %v2242_v57 = vadd.f32 %v2226_v29, %v2210_v49  ;;  %v2209_v24 = vmul.f32 %v3704_v48, %v2177_v51  ;;  %v2192_v60 = vadd.f32 %v2781_v56, %v3702_v34 }
 0x525   : > { %v2186_v2 = vpop.f32.mrf.mxu1 }
 0x526   : > { %2258 = vst.msk [vmem:[%s3714_s24 + $0x68] sm:$0xff] %vm445_vm0, %v2242_v57  ;;  %v2241_v61 = vadd.f32 %v2225_v54, %v2209_v24  ;;  %v2212_v6 = vmul.f32 %v3704_v48, %v2192_v60  ;;  %v2187_v18 = vadd.f32 %v3702_v34, %v2186_v2 }
 0x528   : > { %2257 = vst.msk [vmem:[%s3714_s24 + $0x60] sm:$0xff] %vm445_vm0, %v2241_v61  ;;  %v2244_v11 = vadd.f32 %v2228_v9, %v2212_v6  ;;  %v2211_v23 = vmul.f32 %v3704_v48, %v2187_v18 }
 0x52a   : > { %2260 = vst.msk [vmem:[%s3714_s24 + $0x78] sm:$0xff] %vm445_vm0, %v2244_v11  ;;  %v2243_v10 = vadd.f32 %v2227_v16, %v2211_v23 }
 0x52c   : > { %2259 = vst.msk [vmem:[%s3714_s24 + $0x70] sm:$0xff] %vm445_vm0, %v2243_v10 }
 0x52d PF: > { %s20_s13 = sadd.s32 1, %s2929_s13   ;;  %s3824_s11 = smov %s2925_s12 }
 0x52e   : > { %p17_p5 = scmp.ge.s32.totalorder %s20_s13, 4   ;;  %s3825_s12 = smov %s3827_s8 }
 0x530   :  { %19 = sbr.rel (!%p17_p5) target bundleno = 2 (0x2), region = 97 }

</bundles_post_ra>
